<compile_context>
chip_gen: v7x
topology: tpu7x:2x2x1
jax: 0.10.0
libtpu: 0.0.40
codegen_flags: <defaults>
</compile_context>

<pallas_src>
import math
import functools

import jax
import jax.numpy as jnp
from jax import lax
from jax.experimental import pallas as pl
from jax.experimental.pallas import tpu as pltpu


# ----------------------------- config -----------------------------
class VisionConfig:
    def __init__(self, hidden_size=768, intermediate_size=3072, num_hidden_layers=12,
                 num_attention_heads=12, num_channels=3, image_size=224,
                 patch_size=16, layer_norm_eps=1e-6, attention_dropout=0.0,
                 num_image_tokens=None, **kwargs):
        self.hidden_size = hidden_size
        self.intermediate_size = intermediate_size
        self.num_hidden_layers = num_hidden_layers
        self.num_attention_heads = num_attention_heads
        self.num_channels = num_channels
        self.patch_size = patch_size
        self.image_size = image_size
        self.attention_dropout = attention_dropout
        self.layer_norm_eps = layer_norm_eps
        self.num_image_tokens = num_image_tokens


# ----------------------------- helpers -----------------------------
def _layer_norm(x, gamma, beta, eps):
    mean = jnp.mean(x, axis=-1, keepdims=True)
    var = jnp.mean(jnp.square(x - mean), axis=-1, keepdims=True)
    return (x - mean) * lax.rsqrt(var + eps) * gamma + beta


def _gelu_tanh(x):
    # matches torch nn.GELU(approximate="tanh")
    c = math.sqrt(2.0 / math.pi)
    return 0.5 * x * (1.0 + jnp.tanh(c * (x + 0.044715 * x * x * x)))


# ----------------------------- Pallas kernel -----------------------------
def encoder_stack_kernel(x_ref,                 # (TB, Np, D)  current batch block
                         ln_ref,                # (1, 4, D)    ln1_g, ln1_b, ln2_g, ln2_b (f32)
                         wqkv_ref, bqkv_ref,    # (1, D, 3D) [matmul dtype], (1, 1, 3D) f32
                         wo_ref, bo_ref,        # (1, D, D),  (1, 1, D)
                         w1_ref, b1_ref,        # (1, D, I),  (1, 1, I)
                         w2_ref, b2_ref,        # (1, I, D),  (1, 1, D)
                         out_ref,               # (TB, Np, D)
                         x_scr,                 # VMEM (TB*Np, D) f32 — resident across layers
                         attn_scr,              # VMEM (TB*Np, D) f32 — concatenated head outputs
                         *, num_heads, eps, valid_n, matmul_dtype):
    l = pl.program_id(1)                        # layer index (minor, sequential)
    last_l = pl.num_programs(1) - 1

    TB, Np, D = x_ref.shape
    M = TB * Np
    hd = D // num_heads

    # Load the input once per batch block; afterwards the running activation
    # stays in VMEM scratch across all L layer steps (no HBM round trips).
    @pl.when(l == 0)
    def _():
        x_scr[...] = x_ref[...].reshape(M, D).astype(jnp.float32)

    x = x_scr[...]                              # (M, D) f32

    def mm(a, w):
        # Cast the activation at the MXU boundary only; weights already arrive
        # in their streaming dtype (bf16 at production sizes); f32 accumulate.
        return jnp.dot(a.astype(w.dtype), w, preferred_element_type=jnp.float32)

    ln = ln_ref[0]                              # (4, D) f32
    ln1_g, ln1_b = ln[0:1], ln[1:2]
    ln2_g, ln2_b = ln[2:3], ln[3:4]

    # ---- LayerNorm 1 ----
    h = _layer_norm(x, ln1_g, ln1_b, eps)       # (M, D)

    # ---- packed QKV projection (one (D, 3D) MXU push; scale folded into Q) ----
    qkv = mm(h, wqkv_ref[0]) + bqkv_ref[0]      # (M, 3D) f32
    qkv = qkv.reshape(TB, Np, 3 * D)            # free: splits leading (sublane-tiled) dim

    # static key mask for padded token columns (only materialized when padded)
    if valid_n != Np:
        col = lax.broadcasted_iota(jnp.int32, (TB, Np, Np), 2)
        key_mask = col < valid_n

    # ---- attention: per-head static lane slices, per-image batched matmuls ----
    # TODO(synk): for large N (e.g. padded 256 for ViT) tile the softmax/PV over
    # query-row blocks (or lax.fori_loop the head loop) to bound vreg live ranges.
    for hh in range(num_heads):
        lo = hh * hd
        q_h = qkv[:, :, lo:lo + hd].astype(matmul_dtype)           # (TB, Np, hd)
        k_h = qkv[:, :, D + lo:D + lo + hd].astype(matmul_dtype)
        v_h = qkv[:, :, 2 * D + lo:2 * D + lo + hd].astype(matmul_dtype)

        s = jnp.einsum('bqd,bkd->bqk', q_h, k_h,
                       preferred_element_type=jnp.float32)          # (TB, Np, Np)
        if valid_n != Np:
            s = jnp.where(key_mask, s, -1e30)
        s = s - jnp.max(s, axis=-1, keepdims=True)
        p = jnp.exp(s)
        # softmax denominator via EUP reciprocal, applied to the small (Np,hd)
        # PV output instead of the (Np,Np) probabilities.
        inv_l = pl.reciprocal(jnp.sum(p, axis=-1, keepdims=True), approx=True)
        o_h = jnp.einsum('bqk,bkd->bqd', p.astype(matmul_dtype), v_h,
                         preferred_element_type=jnp.float32) * inv_l
        attn_scr[:, lo:lo + hd] = o_h.reshape(M, hd)

    # ---- single full-depth (K = D) output projection + residual 1 ----
    x = x + mm(attn_scr[...], wo_ref[0]) + bo_ref[0]

    # ---- LayerNorm 2 + MLP (tanh-GELU) + residual 2 ----
    h2 = _layer_norm(x, ln2_g, ln2_b, eps)
    m = _gelu_tanh(mm(h2, w1_ref[0]) + b1_ref[0])
    x = x + mm(m, w2_ref[0]) + b2_ref[0]

    # keep the running activation in VMEM (skip the redundant final store)
    @pl.when(l != last_l)
    def _():
        x_scr[...] = x

    # Only the final layer writes the output block back to HBM.  (Correct
    # because the out block index is constant along the layer axis, so the
    # block is revisited and flushed only after the last layer.)
    @pl.when(l == last_l)
    def _():
        out_ref[...] = x.reshape(TB, Np, D).astype(out_ref.dtype)


# ----------------------------- wrapper -----------------------------
def encoder_forward(inputs_embeds, params, config: VisionConfig):
    """[B, N, D] -> [B, N, D]; whole encoder stack in one pallas_call."""
    B, N, D = inputs_embeds.shape
    L = config.num_hidden_layers
    I = config.intermediate_size
    H = config.num_attention_heads
    eps = config.layer_norm_eps
    assert D % H == 0, "hidden_size must be divisible by num_attention_heads"
    hd = D // H

    # Batch block: amortize weight streaming over several images per grid step.
    TB = math.gcd(B, 8)                       # largest power-of-two divisor of B, <= 8

    # Pad the token axis to a sublane multiple; padded key columns are masked.
    # TODO(synk): pad to 128/256 at production N (ViT's 197) for lane-dense scores.
    Np = ((N + 7) // 8) * 8
    x = inputs_embeds
    if Np != N:
        x = jnp.pad(x, ((0, 0), (0, Np - N), (0, 0)))

    # Weights stream in bf16 at production sizes (halves HBM traffic, fits v7x
    # VMEM double-buffering); stay f32 at toy sizes for exact checking.
    matmul_dtype = jnp.bfloat16 if D >= 128 else jnp.float32

    # Fold 1/sqrt(hd) into the Q third of the packed QKV weight + bias.
    scale = hd ** -0.5
    wqkv = params['wqkv'].at[:, :, :D].multiply(scale).astype(matmul_dtype)
    bqkv = params['bqkv'].at[:, :, :D].multiply(scale)
    wo = params['wo'].astype(matmul_dtype)
    w1 = params['w1'].astype(matmul_dtype)
    w2 = params['w2'].astype(matmul_dtype)

    kernel = functools.partial(encoder_stack_kernel, num_heads=H, eps=eps,
                               valid_n=N, matmul_dtype=matmul_dtype)

    # Per-layer (stacked) params: block index depends only on the layer axis.
    def lspec(shape):
        return pl.BlockSpec((1,) + shape, lambda b, l: (l, 0, 0))

    in_specs = [
        pl.BlockSpec((TB, Np, D), lambda b, l: (b, 0, 0)),   # activations
        lspec((4, D)),          # ln params (f32)
        lspec((D, 3 * D)),      # wqkv
        lspec((1, 3 * D)),      # bqkv
        lspec((D, D)),          # wo
        lspec((1, D)),          # bo
        lspec((D, I)),          # w1
        lspec((1, I)),          # b1
        lspec((I, D)),          # w2
        lspec((1, D)),          # b2
    ]

    # ---- VMEM budget (double-buffered weights + activation blocks + scratch) ----
    wt = jnp.dtype(matmul_dtype).itemsize
    act_bytes = TB * Np * D * 4
    weight_bytes = (D * 3 * D + D * D + D * I + I * D) * wt + (4 * D + 3 * D + 2 * D + I) * 4
    needed = 2 * act_bytes + 2 * (2 * act_bytes) + 2 * weight_bytes
    vmem_limit = int(min(64 * 2**20, max(32 * 2**20, 1.5 * needed)))
    # TODO(synk): for ViT-L/H on v7x, K-tile the MLP weights (extra grid axis or
    # pltpu.emit_pipeline over I-chunks) so double-buffering still fits 64 MiB.

    flops = 2 * B * L * Np * D * (4 * D + 2 * I) + 4 * B * L * Np * Np * D
    transcend = B * L * (H * Np * Np + Np * I)
    bytes_acc = (B // TB) * L * weight_bytes + 2 * B * Np * D * 4

    out = pl.pallas_call(
        kernel,
        out_shape=jax.ShapeDtypeStruct((B, Np, D), inputs_embeds.dtype),
        grid_spec=pltpu.PrefetchScalarGridSpec(
            num_scalar_prefetch=0,
            grid=(B // TB, L),                  # batch parallel, layers sequential
            in_specs=in_specs,
            out_specs=pl.BlockSpec((TB, Np, D), lambda b, l: (b, 0, 0)),
            scratch_shapes=[pltpu.VMEM((TB * Np, D), jnp.float32),   # running activation
                            pltpu.VMEM((TB * Np, D), jnp.float32)],  # head-output concat
        ),
        compiler_params=pltpu.CompilerParams(
            dimension_semantics=("parallel", "arbitrary"),
            vmem_limit_bytes=vmem_limit),
        cost_estimate=pl.CostEstimate(flops=int(flops),
                                      transcendentals=int(transcend),
                                      bytes_accessed=int(bytes_acc)),
    )(x, params['ln'], wqkv, bqkv, wo, params['bo'],
      w1, params['b1'], w2, params['b2'])

    if Np != N:
        out = out[:, :N, :]
    return out


# ----------------------------- params -----------------------------
def init_encoder_params(key, config: VisionConfig):
    """Stack per-layer params on a leading L axis; QKV packed into one matrix."""
    D = config.hidden_size
    I = config.intermediate_size
    L = config.num_hidden_layers
    scale = 0.02

    ln, wqkv, bqkv, wo, bo, w1, b1, w2, b2 = ([] for _ in range(9))
    for _ in range(L):
        key, *ks = jax.random.split(key, 13)
        k = iter(ks)
        g1 = 1.0 + 0.1 * jax.random.normal(next(k), (1, D), jnp.float32)
        be1 = 0.1 * jax.random.normal(next(k), (1, D), jnp.float32)
        g2 = 1.0 + 0.05 * jax.random.normal(next(k), (1, D), jnp.float32)
        be2 = 0.05 * jax.random.normal(next(k), (1, D), jnp.float32)
        ln.append(jnp.concatenate([g1, be1, g2, be2], axis=0))        # (4, D)
        wqkv.append(scale * jax.random.normal(next(k), (D, 3 * D), jnp.float32))
        bqkv.append(scale * jax.random.normal(next(k), (1, 3 * D), jnp.float32))
        wo.append(scale * jax.random.normal(next(k), (D, D), jnp.float32))
        bo.append(scale * jax.random.normal(next(k), (1, D), jnp.float32))
        w1.append(scale * jax.random.normal(next(k), (D, I), jnp.float32))
        b1.append(scale * jax.random.normal(next(k), (1, I), jnp.float32))
        w2.append(scale * jax.random.normal(next(k), (I, D), jnp.float32))
        b2.append(scale * jax.random.normal(next(k), (1, D), jnp.float32))

    stack = lambda xs: jnp.stack(xs, axis=0)
    return dict(ln=stack(ln), wqkv=stack(wqkv), bqkv=stack(bqkv),
                wo=stack(wo), bo=stack(bo),
                w1=stack(w1), b1=stack(b1), w2=stack(w2), b2=stack(b2))


# ----------------------------- pure-JAX reference -----------------------------
def encoder_forward_ref(x, params, config: VisionConfig):
    D = config.hidden_size
    H = config.num_attention_heads
    hd = D // H
    eps = config.layer_norm_eps
    B, N, _ = x.shape
    for l in range(config.num_hidden_layers):
        ln = params['ln'][l]
        h = _layer_norm(x, ln[0], ln[1], eps)
        qkv = h @ params['wqkv'][l] + params['bqkv'][l]
        q, k, v = jnp.split(qkv, 3, axis=-1)
        q = q.reshape(B, N, H, hd) * hd ** -0.5
        k = k.reshape(B, N, H, hd)
        v = v.reshape(B, N, H, hd)
        s = jnp.einsum('bqhd,bkhd->bhqk', q, k)
        a = jax.nn.softmax(s, axis=-1)
        o = jnp.einsum('bhqk,bkhd->bqhd', a, v).reshape(B, N, D)
        x = x + (o @ params['wo'][l] + params['bo'][l])
        h2 = _layer_norm(x, ln[2], ln[3], eps)
        m = _gelu_tanh(h2 @ params['w1'][l] + params['b1'][l])
        x = x + (m @ params['w2'][l] + params['b2'][l])
    return x


# ----------------------------- main -----------------------------
if __name__ == "__main__":
    key = jax.random.PRNGKey(0)
    k_in, k_param, k_in2, k_param2 = jax.random.split(key, 4)

    # ---- primary check: toy shapes, exact f32 matmul path ----
    config = VisionConfig(hidden_size=32, intermediate_size=64,
                          num_hidden_layers=2, num_attention_heads=4)
    B, N, D = 2, 8, config.hidden_size
    inputs_embeds = jax.random.normal(k_in, (B, N, D), jnp.float32)
    params = init_encoder_params(k_param, config)

    out = jax.block_until_ready(encoder_forward(inputs_embeds, params, config))
    ref = encoder_forward_ref(inputs_embeds, params, config)
    assert out.shape == (B, N, D)
    max_err = float(jnp.max(jnp.abs(out - ref)))
    # tolerance accounts for pl.reciprocal(approx=True) in the softmax (~1e-3 rel)
    assert jnp.allclose(out, ref, atol=5e-3, rtol=5e-3), \
        f"f32 path mismatch vs reference (max abs err {max_err})"

    # ---- secondary check: bf16 weight-streaming path + token padding/masking ----
    config2 = VisionConfig(hidden_size=128, intermediate_size=256,
                           num_hidden_layers=2, num_attention_heads=4)
    B2, N2 = 2, 13            # N2 not a multiple of 8 -> exercises pad + key-mask path
    inputs2 = jax.random.normal(k_in2, (B2, N2, config2.hidden_size), jnp.float32)
    params2 = init_encoder_params(k_param2, config2)
    out2 = jax.block_until_ready(encoder_forward(inputs2, params2, config2))
    ref2 = encoder_forward_ref(inputs2, params2, config2)
    assert out2.shape == (B2, N2, config2.hidden_size)
    max_err2 = float(jnp.max(jnp.abs(out2 - ref2)))
    assert jnp.allclose(out2, ref2, atol=5e-2, rtol=5e-2), \
        f"bf16 path mismatch vs reference (max abs err {max_err2})"

    print("KERNEL_OK")
</pallas_src>

<mosaic_0001>
module attributes {stable_mosaic.version = 11 : i64} {
  func.func @encoder_stack_kernel(%arg0: i32, %arg1: i32, %arg2: memref<2x8x32xf32, #tpu.memory_space<vmem>>, %arg3: memref<1x4x32xf32, #tpu.memory_space<vmem>>, %arg4: memref<1x32x96xf32, #tpu.memory_space<vmem>>, %arg5: memref<1x1x96xf32, #tpu.memory_space<vmem>>, %arg6: memref<1x32x32xf32, #tpu.memory_space<vmem>>, %arg7: memref<1x1x32xf32, #tpu.memory_space<vmem>>, %arg8: memref<1x32x64xf32, #tpu.memory_space<vmem>>, %arg9: memref<1x1x64xf32, #tpu.memory_space<vmem>>, %arg10: memref<1x64x32xf32, #tpu.memory_space<vmem>>, %arg11: memref<1x1x32xf32, #tpu.memory_space<vmem>>, %arg12: memref<2x8x32xf32, #tpu.memory_space<vmem>>, %arg13: memref<16x32xf32, #tpu.memory_space<vmem>>, %arg14: memref<16x32xf32, #tpu.memory_space<vmem>>) attributes {dimension_semantics = [#tpu.dimension_semantics<parallel>, #tpu.dimension_semantics<arbitrary>], iteration_bounds = array<i64: 1, 2>, scalar_prefetch = 0 : i64, scratch_operands = 2 : i64, tpu.core_type = #tpu.core_type<tc>, window_params = [{transform_indices = @transform_0, window_bounds = array<i64: 2, 8, 32>}, {transform_indices = @transform_1, window_bounds = array<i64: 1, 4, 32>}, {transform_indices = @transform_2, window_bounds = array<i64: 1, 32, 96>}, {transform_indices = @transform_3, window_bounds = array<i64: 1, 1, 96>}, {transform_indices = @transform_4, window_bounds = array<i64: 1, 32, 32>}, {transform_indices = @transform_5, window_bounds = array<i64: 1, 1, 32>}, {transform_indices = @transform_6, window_bounds = array<i64: 1, 32, 64>}, {transform_indices = @transform_7, window_bounds = array<i64: 1, 1, 64>}, {transform_indices = @transform_8, window_bounds = array<i64: 1, 64, 32>}, {transform_indices = @transform_9, window_bounds = array<i64: 1, 1, 32>}, {transform_indices = @transform_10, window_bounds = array<i64: 2, 8, 32>}]} {
    %c0_i32 = arith.constant 0 : i32
    %0 = arith.cmpi eq, %arg1, %c0_i32 : i32
    %1 = arith.extui %0 : i1 to i32
    %c0_i32_0 = arith.constant 0 : i32
    %2 = arith.cmpi ne, %1, %c0_i32_0 : i32
    scf.if %2 {
      %c0_72 = arith.constant 0 : index
      %c0_73 = arith.constant 0 : index
      %c0_74 = arith.constant 0 : index
      %173 = vector.load %arg2[%c0_72, %c0_73, %c0_74] : memref<2x8x32xf32, #tpu.memory_space<vmem>>, vector<2x8x32xf32>
      %174 = vector.shape_cast %173 : vector<2x8x32xf32> to vector<16x32xf32>
      %c0_75 = arith.constant 0 : index
      %c0_76 = arith.constant 0 : index
      %175 = vector.load %arg13[%c0_75, %c0_76] : memref<16x32xf32, #tpu.memory_space<vmem>>, vector<16x32xf32>
      tpu.vector_store %arg13[%c0_75, %c0_76], %174 {strides = array<i32>} : memref<16x32xf32, #tpu.memory_space<vmem>>, vector<16x32xf32>,
    } else {
    }
    %c0 = arith.constant 0 : index
    %c0_1 = arith.constant 0 : index
    %3 = vector.load %arg13[%c0, %c0_1] : memref<16x32xf32, #tpu.memory_space<vmem>>, vector<16x32xf32>
    %c0_2 = arith.constant 0 : index
    %c0_3 = arith.constant 0 : index
    %c0_4 = arith.constant 0 : index
    %4 = vector.load %arg3[%c0_2, %c0_3, %c0_4] : memref<1x4x32xf32, #tpu.memory_space<vmem>>, vector<1x4x32xf32>
    %5 = vector.shape_cast %4 : vector<1x4x32xf32> to vector<4x32xf32>
    %6 = vector.extract_strided_slice %5 {offsets = [0, 0], sizes = [1, 32], strides = [1, 1]} : vector<4x32xf32> to vector<1x32xf32>
    %7 = vector.extract_strided_slice %5 {offsets = [1, 0], sizes = [1, 32], strides = [1, 1]} : vector<4x32xf32> to vector<1x32xf32>
    %8 = vector.extract_strided_slice %5 {offsets = [2, 0], sizes = [1, 32], strides = [1, 1]} : vector<4x32xf32> to vector<1x32xf32>
    %9 = vector.extract_strided_slice %5 {offsets = [3, 0], sizes = [1, 32], strides = [1, 1]} : vector<4x32xf32> to vector<1x32xf32>
    %cst = arith.constant dense<0.000000e+00> : vector<16xf32>
    %10 = vector.multi_reduction <add>, %3, %cst [1] : vector<16x32xf32> to vector<16xf32>
    %11 = vector.shape_cast %10 : vector<16xf32> to vector<16x1xf32>
    %cst_5 = arith.constant 3.200000e+01 : f32
    %12 = vector.broadcast %cst_5 : f32 to vector<16x1xf32>
    %13 = arith.divf %11, %12 : vector<16x1xf32>
    %14 = vector.broadcast %13 : vector<16x1xf32> to vector<16x32xf32>
    %15 = arith.subf %3, %14 : vector<16x32xf32>
    %16 = arith.mulf %15, %15 : vector<16x32xf32>
    %cst_6 = arith.constant dense<0.000000e+00> : vector<16xf32>
    %17 = vector.multi_reduction <add>, %16, %cst_6 [1] : vector<16x32xf32> to vector<16xf32>
    %18 = vector.shape_cast %17 : vector<16xf32> to vector<16x1xf32>
    %cst_7 = arith.constant 3.200000e+01 : f32
    %19 = vector.broadcast %cst_7 : f32 to vector<16x1xf32>
    %20 = arith.divf %18, %19 : vector<16x1xf32>
    %21 = vector.broadcast %13 : vector<16x1xf32> to vector<16x32xf32>
    %22 = arith.subf %3, %21 : vector<16x32xf32>
    %cst_8 = arith.constant 9.99999997E-7 : f32
    %23 = vector.broadcast %cst_8 : f32 to vector<16x1xf32>
    %24 = arith.addf %20, %23 : vector<16x1xf32>
    %25 = math.rsqrt %24 : vector<16x1xf32>
    %26 = vector.broadcast %25 : vector<16x1xf32> to vector<16x32xf32>
    %27 = arith.mulf %22, %26 : vector<16x32xf32>
    %28 = vector.broadcast %6 : vector<1x32xf32> to vector<16x32xf32>
    %29 = arith.mulf %27, %28 : vector<16x32xf32>
    %30 = vector.broadcast %7 : vector<1x32xf32> to vector<16x32xf32>
    %31 = arith.addf %29, %30 : vector<16x32xf32>
    %c0_9 = arith.constant 0 : index
    %c0_10 = arith.constant 0 : index
    %c0_11 = arith.constant 0 : index
    %32 = vector.load %arg4[%c0_9, %c0_10, %c0_11] : memref<1x32x96xf32, #tpu.memory_space<vmem>>, vector<1x32x96xf32>
    %33 = vector.shape_cast %32 : vector<1x32x96xf32> to vector<32x96xf32>
    %cst_12 = arith.constant dense<0.000000e+00> : vector<16x96xf32>
    %34 = tpu.matmul %31, %33, %cst_12 {dimension_numbers = #tpu.dot_dimension_numbers<[1], [0], [0], [1], [0, 0, 1, 1], [], []>} : vector<16x32xf32>, vector<32x96xf32>, vector<16x96xf32> -> vector<16x96xf32>
    %c0_13 = arith.constant 0 : index
    %c0_14 = arith.constant 0 : index
    %c0_15 = arith.constant 0 : index
    %35 = vector.load %arg5[%c0_13, %c0_14, %c0_15] : memref<1x1x96xf32, #tpu.memory_space<vmem>>, vector<1x1x96xf32>
    %36 = vector.shape_cast %35 : vector<1x1x96xf32> to vector<1x96xf32>
    %37 = vector.broadcast %36 : vector<1x96xf32> to vector<16x96xf32>
    %38 = arith.addf %34, %37 : vector<16x96xf32>
    %39 = vector.shape_cast %38 : vector<16x96xf32> to vector<2x8x96xf32>
    %40 = vector.extract_strided_slice %39 {offsets = [0, 0, 0], sizes = [2, 8, 8], strides = [1, 1, 1]} : vector<2x8x96xf32> to vector<2x8x8xf32>
    %41 = vector.extract_strided_slice %39 {offsets = [0, 0, 32], sizes = [2, 8, 8], strides = [1, 1, 1]} : vector<2x8x96xf32> to vector<2x8x8xf32>
    %42 = vector.extract_strided_slice %39 {offsets = [0, 0, 64], sizes = [2, 8, 8], strides = [1, 1, 1]} : vector<2x8x96xf32> to vector<2x8x8xf32>
    "tpu.trace_start"() <{level = 10 : i32, message = "bqd,bkd->bqk"}> : () -> ()
    %cst_16 = arith.constant dense<0.000000e+00> : vector<2x8x8xf32>
    %43 = tpu.matmul %40, %41, %cst_16 {dimension_numbers = #tpu.dot_dimension_numbers<[2], [2], [1], [1], [0, 0, 0, 1, 1, 1], [0], [0]>} : vector<2x8x8xf32>, vector<2x8x8xf32>, vector<2x8x8xf32> -> vector<2x8x8xf32>
    "tpu.trace_stop"() : () -> ()
    %cst_17 = arith.constant dense<0xFF800000> : vector<2x8xf32>
    %44 = vector.multi_reduction <maximumf>, %43, %cst_17 [2] : vector<2x8x8xf32> to vector<2x8xf32>
    %45 = vector.shape_cast %44 : vector<2x8xf32> to vector<2x8x1xf32>
    %46 = vector.broadcast %45 : vector<2x8x1xf32> to vector<2x8x8xf32>
    %47 = arith.subf %43, %46 : vector<2x8x8xf32>
    %48 = math.exp %47 : vector<2x8x8xf32>
    %cst_18 = arith.constant dense<0.000000e+00> : vector<2x8xf32>
    %49 = vector.multi_reduction <add>, %48, %cst_18 [2] : vector<2x8x8xf32> to vector<2x8xf32>
    %50 = vector.shape_cast %49 : vector<2x8xf32> to vector<2x8x1xf32>
    %51 = tpu.reciprocal %50 {approx = true} : vector<2x8x1xf32> -> vector<2x8x1xf32>
    "tpu.trace_start"() <{level = 10 : i32, message = "bqk,bkd->bqd"}> : () -> ()
    %cst_19 = arith.constant dense<0.000000e+00> : vector<2x8x8xf32>
    %52 = tpu.matmul %48, %42, %cst_19 {dimension_numbers = #tpu.dot_dimension_numbers<[2], [1], [1], [2], [0, 0, 0, 1, 1, 2], [0], [0]>} : vector<2x8x8xf32>, vector<2x8x8xf32>, vector<2x8x8xf32> -> vector<2x8x8xf32>
    "tpu.trace_stop"() : () -> ()
    %53 = vector.broadcast %51 : vector<2x8x1xf32> to vector<2x8x8xf32>
    %54 = arith.mulf %52, %53 : vector<2x8x8xf32>
    %55 = vector.shape_cast %54 : vector<2x8x8xf32> to vector<16x8xf32>
    %c0_20 = arith.constant 0 : index
    %c0_21 = arith.constant 0 : index
    %56 = vector.load %arg14[%c0_20, %c0_21] : memref<16x32xf32, #tpu.memory_space<vmem>>, vector<16x8xf32>
    tpu.vector_store %arg14[%c0_20, %c0_21], %55 {strides = array<i32>} : memref<16x32xf32, #tpu.memory_space<vmem>>, vector<16x8xf32>,
    %57 = vector.extract_strided_slice %39 {offsets = [0, 0, 8], sizes = [2, 8, 8], strides = [1, 1, 1]} : vector<2x8x96xf32> to vector<2x8x8xf32>
    %58 = vector.extract_strided_slice %39 {offsets = [0, 0, 40], sizes = [2, 8, 8], strides = [1, 1, 1]} : vector<2x8x96xf32> to vector<2x8x8xf32>
    %59 = vector.extract_strided_slice %39 {offsets = [0, 0, 72], sizes = [2, 8, 8], strides = [1, 1, 1]} : vector<2x8x96xf32> to vector<2x8x8xf32>
    "tpu.trace_start"() <{level = 10 : i32, message = "bqd,bkd->bqk"}> : () -> ()
    %cst_22 = arith.constant dense<0.000000e+00> : vector<2x8x8xf32>
    %60 = tpu.matmul %57, %58, %cst_22 {dimension_numbers = #tpu.dot_dimension_numbers<[2], [2], [1], [1], [0, 0, 0, 1, 1, 1], [0], [0]>} : vector<2x8x8xf32>, vector<2x8x8xf32>, vector<2x8x8xf32> -> vector<2x8x8xf32>
    "tpu.trace_stop"() : () -> ()
    %cst_23 = arith.constant dense<0xFF800000> : vector<2x8xf32>
    %61 = vector.multi_reduction <maximumf>, %60, %cst_23 [2] : vector<2x8x8xf32> to vector<2x8xf32>
    %62 = vector.shape_cast %61 : vector<2x8xf32> to vector<2x8x1xf32>
    %63 = vector.broadcast %62 : vector<2x8x1xf32> to vector<2x8x8xf32>
    %64 = arith.subf %60, %63 : vector<2x8x8xf32>
    %65 = math.exp %64 : vector<2x8x8xf32>
    %cst_24 = arith.constant dense<0.000000e+00> : vector<2x8xf32>
    %66 = vector.multi_reduction <add>, %65, %cst_24 [2] : vector<2x8x8xf32> to vector<2x8xf32>
    %67 = vector.shape_cast %66 : vector<2x8xf32> to vector<2x8x1xf32>
    %68 = tpu.reciprocal %67 {approx = true} : vector<2x8x1xf32> -> vector<2x8x1xf32>
    "tpu.trace_start"() <{level = 10 : i32, message = "bqk,bkd->bqd"}> : () -> ()
    %cst_25 = arith.constant dense<0.000000e+00> : vector<2x8x8xf32>
    %69 = tpu.matmul %65, %59, %cst_25 {dimension_numbers = #tpu.dot_dimension_numbers<[2], [1], [1], [2], [0, 0, 0, 1, 1, 2], [0], [0]>} : vector<2x8x8xf32>, vector<2x8x8xf32>, vector<2x8x8xf32> -> vector<2x8x8xf32>
    "tpu.trace_stop"() : () -> ()
    %70 = vector.broadcast %68 : vector<2x8x1xf32> to vector<2x8x8xf32>
    %71 = arith.mulf %69, %70 : vector<2x8x8xf32>
    %72 = vector.shape_cast %71 : vector<2x8x8xf32> to vector<16x8xf32>
    %c0_26 = arith.constant 0 : index
    %c8 = arith.constant 8 : index
    %73 = vector.load %arg14[%c0_26, %c8] : memref<16x32xf32, #tpu.memory_space<vmem>>, vector<16x8xf32>
    tpu.vector_store %arg14[%c0_26, %c8], %72 {strides = array<i32>} : memref<16x32xf32, #tpu.memory_space<vmem>>, vector<16x8xf32>,
    %74 = vector.extract_strided_slice %39 {offsets = [0, 0, 16], sizes = [2, 8, 8], strides = [1, 1, 1]} : vector<2x8x96xf32> to vector<2x8x8xf32>
    %75 = vector.extract_strided_slice %39 {offsets = [0, 0, 48], sizes = [2, 8, 8], strides = [1, 1, 1]} : vector<2x8x96xf32> to vector<2x8x8xf32>
    %76 = vector.extract_strided_slice %39 {offsets = [0, 0, 80], sizes = [2, 8, 8], strides = [1, 1, 1]} : vector<2x8x96xf32> to vector<2x8x8xf32>
    "tpu.trace_start"() <{level = 10 : i32, message = "bqd,bkd->bqk"}> : () -> ()
    %cst_27 = arith.constant dense<0.000000e+00> : vector<2x8x8xf32>
    %77 = tpu.matmul %74, %75, %cst_27 {dimension_numbers = #tpu.dot_dimension_numbers<[2], [2], [1], [1], [0, 0, 0, 1, 1, 1], [0], [0]>} : vector<2x8x8xf32>, vector<2x8x8xf32>, vector<2x8x8xf32> -> vector<2x8x8xf32>
    "tpu.trace_stop"() : () -> ()
    %cst_28 = arith.constant dense<0xFF800000> : vector<2x8xf32>
    %78 = vector.multi_reduction <maximumf>, %77, %cst_28 [2] : vector<2x8x8xf32> to vector<2x8xf32>
    %79 = vector.shape_cast %78 : vector<2x8xf32> to vector<2x8x1xf32>
    %80 = vector.broadcast %79 : vector<2x8x1xf32> to vector<2x8x8xf32>
    %81 = arith.subf %77, %80 : vector<2x8x8xf32>
    %82 = math.exp %81 : vector<2x8x8xf32>
    %cst_29 = arith.constant dense<0.000000e+00> : vector<2x8xf32>
    %83 = vector.multi_reduction <add>, %82, %cst_29 [2] : vector<2x8x8xf32> to vector<2x8xf32>
    %84 = vector.shape_cast %83 : vector<2x8xf32> to vector<2x8x1xf32>
    %85 = tpu.reciprocal %84 {approx = true} : vector<2x8x1xf32> -> vector<2x8x1xf32>
    "tpu.trace_start"() <{level = 10 : i32, message = "bqk,bkd->bqd"}> : () -> ()
    %cst_30 = arith.constant dense<0.000000e+00> : vector<2x8x8xf32>
    %86 = tpu.matmul %82, %76, %cst_30 {dimension_numbers = #tpu.dot_dimension_numbers<[2], [1], [1], [2], [0, 0, 0, 1, 1, 2], [0], [0]>} : vector<2x8x8xf32>, vector<2x8x8xf32>, vector<2x8x8xf32> -> vector<2x8x8xf32>
    "tpu.trace_stop"() : () -> ()
    %87 = vector.broadcast %85 : vector<2x8x1xf32> to vector<2x8x8xf32>
    %88 = arith.mulf %86, %87 : vector<2x8x8xf32>
    %89 = vector.shape_cast %88 : vector<2x8x8xf32> to vector<16x8xf32>
    %c0_31 = arith.constant 0 : index
    %c16 = arith.constant 16 : index
    %90 = vector.load %arg14[%c0_31, %c16] : memref<16x32xf32, #tpu.memory_space<vmem>>, vector<16x8xf32>
    tpu.vector_store %arg14[%c0_31, %c16], %89 {strides = array<i32>} : memref<16x32xf32, #tpu.memory_space<vmem>>, vector<16x8xf32>,
    %91 = vector.extract_strided_slice %39 {offsets = [0, 0, 24], sizes = [2, 8, 8], strides = [1, 1, 1]} : vector<2x8x96xf32> to vector<2x8x8xf32>
    %92 = vector.extract_strided_slice %39 {offsets = [0, 0, 56], sizes = [2, 8, 8], strides = [1, 1, 1]} : vector<2x8x96xf32> to vector<2x8x8xf32>
    %93 = vector.extract_strided_slice %39 {offsets = [0, 0, 88], sizes = [2, 8, 8], strides = [1, 1, 1]} : vector<2x8x96xf32> to vector<2x8x8xf32>
    "tpu.trace_start"() <{level = 10 : i32, message = "bqd,bkd->bqk"}> : () -> ()
    %cst_32 = arith.constant dense<0.000000e+00> : vector<2x8x8xf32>
    %94 = tpu.matmul %91, %92, %cst_32 {dimension_numbers = #tpu.dot_dimension_numbers<[2], [2], [1], [1], [0, 0, 0, 1, 1, 1], [0], [0]>} : vector<2x8x8xf32>, vector<2x8x8xf32>, vector<2x8x8xf32> -> vector<2x8x8xf32>
    "tpu.trace_stop"() : () -> ()
    %cst_33 = arith.constant dense<0xFF800000> : vector<2x8xf32>
    %95 = vector.multi_reduction <maximumf>, %94, %cst_33 [2] : vector<2x8x8xf32> to vector<2x8xf32>
    %96 = vector.shape_cast %95 : vector<2x8xf32> to vector<2x8x1xf32>
    %97 = vector.broadcast %96 : vector<2x8x1xf32> to vector<2x8x8xf32>
    %98 = arith.subf %94, %97 : vector<2x8x8xf32>
    %99 = math.exp %98 : vector<2x8x8xf32>
    %cst_34 = arith.constant dense<0.000000e+00> : vector<2x8xf32>
    %100 = vector.multi_reduction <add>, %99, %cst_34 [2] : vector<2x8x8xf32> to vector<2x8xf32>
    %101 = vector.shape_cast %100 : vector<2x8xf32> to vector<2x8x1xf32>
    %102 = tpu.reciprocal %101 {approx = true} : vector<2x8x1xf32> -> vector<2x8x1xf32>
    "tpu.trace_start"() <{level = 10 : i32, message = "bqk,bkd->bqd"}> : () -> ()
    %cst_35 = arith.constant dense<0.000000e+00> : vector<2x8x8xf32>
    %103 = tpu.matmul %99, %93, %cst_35 {dimension_numbers = #tpu.dot_dimension_numbers<[2], [1], [1], [2], [0, 0, 0, 1, 1, 2], [0], [0]>} : vector<2x8x8xf32>, vector<2x8x8xf32>, vector<2x8x8xf32> -> vector<2x8x8xf32>
    "tpu.trace_stop"() : () -> ()
    %104 = vector.broadcast %102 : vector<2x8x1xf32> to vector<2x8x8xf32>
    %105 = arith.mulf %103, %104 : vector<2x8x8xf32>
    %106 = vector.shape_cast %105 : vector<2x8x8xf32> to vector<16x8xf32>
    %c0_36 = arith.constant 0 : index
    %c24 = arith.constant 24 : index
    %107 = vector.load %arg14[%c0_36, %c24] : memref<16x32xf32, #tpu.memory_space<vmem>>, vector<16x8xf32>
    tpu.vector_store %arg14[%c0_36, %c24], %106 {strides = array<i32>} : memref<16x32xf32, #tpu.memory_space<vmem>>, vector<16x8xf32>,
    %c0_37 = arith.constant 0 : index
    %c0_38 = arith.constant 0 : index
    %108 = vector.load %arg14[%c0_37, %c0_38] : memref<16x32xf32, #tpu.memory_space<vmem>>, vector<16x32xf32>
    %c0_39 = arith.constant 0 : index
    %c0_40 = arith.constant 0 : index
    %c0_41 = arith.constant 0 : index
    %109 = vector.load %arg6[%c0_39, %c0_40, %c0_41] : memref<1x32x32xf32, #tpu.memory_space<vmem>>, vector<1x32x32xf32>
    %110 = vector.shape_cast %109 : vector<1x32x32xf32> to vector<32x32xf32>
    %cst_42 = arith.constant dense<0.000000e+00> : vector<16x32xf32>
    %111 = tpu.matmul %108, %110, %cst_42 {dimension_numbers = #tpu.dot_dimension_numbers<[1], [0], [0], [1], [0, 0, 1, 1], [], []>} : vector<16x32xf32>, vector<32x32xf32>, vector<16x32xf32> -> vector<16x32xf32>
    %112 = arith.addf %3, %111 : vector<16x32xf32>
    %c0_43 = arith.constant 0 : index
    %c0_44 = arith.constant 0 : index
    %c0_45 = arith.constant 0 : index
    %113 = vector.load %arg7[%c0_43, %c0_44, %c0_45] : memref<1x1x32xf32, #tpu.memory_space<vmem>>, vector<1x1x32xf32>
    %114 = vector.shape_cast %113 : vector<1x1x32xf32> to vector<1x32xf32>
    %115 = vector.broadcast %114 : vector<1x32xf32> to vector<16x32xf32>
    %116 = arith.addf %112, %115 : vector<16x32xf32>
    %cst_46 = arith.constant dense<0.000000e+00> : vector<16xf32>
    %117 = vector.multi_reduction <add>, %116, %cst_46 [1] : vector<16x32xf32> to vector<16xf32>
    %118 = vector.shape_cast %117 : vector<16xf32> to vector<16x1xf32>
    %cst_47 = arith.constant 3.200000e+01 : f32
    %119 = vector.broadcast %cst_47 : f32 to vector<16x1xf32>
    %120 = arith.divf %118, %119 : vector<16x1xf32>
    %121 = vector.broadcast %120 : vector<16x1xf32> to vector<16x32xf32>
    %122 = arith.subf %116, %121 : vector<16x32xf32>
    %123 = arith.mulf %122, %122 : vector<16x32xf32>
    %cst_48 = arith.constant dense<0.000000e+00> : vector<16xf32>
    %124 = vector.multi_reduction <add>, %123, %cst_48 [1] : vector<16x32xf32> to vector<16xf32>
    %125 = vector.shape_cast %124 : vector<16xf32> to vector<16x1xf32>
    %cst_49 = arith.constant 3.200000e+01 : f32
    %126 = vector.broadcast %cst_49 : f32 to vector<16x1xf32>
    %127 = arith.divf %125, %126 : vector<16x1xf32>
    %128 = vector.broadcast %120 : vector<16x1xf32> to vector<16x32xf32>
    %129 = arith.subf %116, %128 : vector<16x32xf32>
    %cst_50 = arith.constant 9.99999997E-7 : f32
    %130 = vector.broadcast %cst_50 : f32 to vector<16x1xf32>
    %131 = arith.addf %127, %130 : vector<16x1xf32>
    %132 = math.rsqrt %131 : vector<16x1xf32>
    %133 = vector.broadcast %132 : vector<16x1xf32> to vector<16x32xf32>
    %134 = arith.mulf %129, %133 : vector<16x32xf32>
    %135 = vector.broadcast %8 : vector<1x32xf32> to vector<16x32xf32>
    %136 = arith.mulf %134, %135 : vector<16x32xf32>
    %137 = vector.broadcast %9 : vector<1x32xf32> to vector<16x32xf32>
    %138 = arith.addf %136, %137 : vector<16x32xf32>
    %c0_51 = arith.constant 0 : index
    %c0_52 = arith.constant 0 : index
    %c0_53 = arith.constant 0 : index
    %139 = vector.load %arg8[%c0_51, %c0_52, %c0_53] : memref<1x32x64xf32, #tpu.memory_space<vmem>>, vector<1x32x64xf32>
    %140 = vector.shape_cast %139 : vector<1x32x64xf32> to vector<32x64xf32>
    %cst_54 = arith.constant dense<0.000000e+00> : vector<16x64xf32>
    %141 = tpu.matmul %138, %140, %cst_54 {dimension_numbers = #tpu.dot_dimension_numbers<[1], [0], [0], [1], [0, 0, 1, 1], [], []>} : vector<16x32xf32>, vector<32x64xf32>, vector<16x64xf32> -> vector<16x64xf32>
    %c0_55 = arith.constant 0 : index
    %c0_56 = arith.constant 0 : index
    %c0_57 = arith.constant 0 : index
    %142 = vector.load %arg9[%c0_55, %c0_56, %c0_57] : memref<1x1x64xf32, #tpu.memory_space<vmem>>, vector<1x1x64xf32>
    %143 = vector.shape_cast %142 : vector<1x1x64xf32> to vector<1x64xf32>
    %144 = vector.broadcast %143 : vector<1x64xf32> to vector<16x64xf32>
    %145 = arith.addf %141, %144 : vector<16x64xf32>
    %cst_58 = arith.constant 5.000000e-01 : f32
    %146 = vector.broadcast %cst_58 : f32 to vector<16x64xf32>
    %147 = arith.mulf %146, %145 : vector<16x64xf32>
    %cst_59 = arith.constant 4.471500e-02 : f32
    %148 = vector.broadcast %cst_59 : f32 to vector<16x64xf32>
    %149 = arith.mulf %148, %145 : vector<16x64xf32>
    %150 = arith.mulf %149, %145 : vector<16x64xf32>
    %151 = arith.mulf %150, %145 : vector<16x64xf32>
    %152 = arith.addf %145, %151 : vector<16x64xf32>
    %cst_60 = arith.constant 0.797884583 : f32
    %153 = vector.broadcast %cst_60 : f32 to vector<16x64xf32>
    %154 = arith.mulf %153, %152 : vector<16x64xf32>
    %155 = math.tanh %154 : vector<16x64xf32>
    %cst_61 = arith.constant 1.000000e+00 : f32
    %156 = vector.broadcast %cst_61 : f32 to vector<16x64xf32>
    %157 = arith.addf %156, %155 : vector<16x64xf32>
    %158 = arith.mulf %147, %157 : vector<16x64xf32>
    %c0_62 = arith.constant 0 : index
    %c0_63 = arith.constant 0 : index
    %c0_64 = arith.constant 0 : index
    %159 = vector.load %arg10[%c0_62, %c0_63, %c0_64] : memref<1x64x32xf32, #tpu.memory_space<vmem>>, vector<1x64x32xf32>
    %160 = vector.shape_cast %159 : vector<1x64x32xf32> to vector<64x32xf32>
    %cst_65 = arith.constant dense<0.000000e+00> : vector<16x32xf32>
    %161 = tpu.matmul %158, %160, %cst_65 {dimension_numbers = #tpu.dot_dimension_numbers<[1], [0], [0], [1], [0, 0, 1, 1], [], []>} : vector<16x64xf32>, vector<64x32xf32>, vector<16x32xf32> -> vector<16x32xf32>
    %162 = arith.addf %116, %161 : vector<16x32xf32>
    %c0_66 = arith.constant 0 : index
    %c0_67 = arith.constant 0 : index
    %c0_68 = arith.constant 0 : index
    %163 = vector.load %arg11[%c0_66, %c0_67, %c0_68] : memref<1x1x32xf32, #tpu.memory_space<vmem>>, vector<1x1x32xf32>
    %164 = vector.shape_cast %163 : vector<1x1x32xf32> to vector<1x32xf32>
    %165 = vector.broadcast %164 : vector<1x32xf32> to vector<16x32xf32>
    %166 = arith.addf %162, %165 : vector<16x32xf32>
    %c1_i32 = arith.constant 1 : i32
    %167 = arith.cmpi ne, %arg1, %c1_i32 : i32
    %168 = arith.extui %167 : i1 to i32
    %c0_i32_69 = arith.constant 0 : i32
    %169 = arith.cmpi ne, %168, %c0_i32_69 : i32
    scf.if %169 {
      %c0_72 = arith.constant 0 : index
      %c0_73 = arith.constant 0 : index
      %173 = vector.load %arg13[%c0_72, %c0_73] : memref<16x32xf32, #tpu.memory_space<vmem>>, vector<16x32xf32>
      tpu.vector_store %arg13[%c0_72, %c0_73], %166 {strides = array<i32>} : memref<16x32xf32, #tpu.memory_space<vmem>>, vector<16x32xf32>,
    } else {
    }
    %c1_i32_70 = arith.constant 1 : i32
    %170 = arith.cmpi eq, %arg1, %c1_i32_70 : i32
    %171 = arith.extui %170 : i1 to i32
    %c0_i32_71 = arith.constant 0 : i32
    %172 = arith.cmpi ne, %171, %c0_i32_71 : i32
    scf.if %172 {
      %173 = vector.shape_cast %166 : vector<16x32xf32> to vector<2x8x32xf32>
      %c0_72 = arith.constant 0 : index
      %c0_73 = arith.constant 0 : index
      %c0_74 = arith.constant 0 : index
      %174 = vector.load %arg12[%c0_72, %c0_73, %c0_74] : memref<2x8x32xf32, #tpu.memory_space<vmem>>, vector<2x8x32xf32>
      tpu.vector_store %arg12[%c0_72, %c0_73, %c0_74], %173 {strides = array<i32>} : memref<2x8x32xf32, #tpu.memory_space<vmem>>, vector<2x8x32xf32>,
    } else {
    }
    return
  }
  func.func @transform_0(%arg0: i32, %arg1: i32) -> (i32, i32, i32) {
    %c0_i32 = arith.constant 0 : i32
    %c0_i32_0 = arith.constant 0 : i32
    %c0_i32_1 = arith.constant 0 : i32
    return %arg0, %c0_i32, %c0_i32_0 : i32, i32, i32
  }
  func.func @transform_1(%arg0: i32, %arg1: i32) -> (i32, i32, i32) {
    %c0_i32 = arith.constant 0 : i32
    %c0_i32_0 = arith.constant 0 : i32
    %c0_i32_1 = arith.constant 0 : i32
    return %arg1, %c0_i32, %c0_i32_0 : i32, i32, i32
  }
  func.func @transform_2(%arg0: i32, %arg1: i32) -> (i32, i32, i32) {
    %c0_i32 = arith.constant 0 : i32
    %c0_i32_0 = arith.constant 0 : i32
    %c0_i32_1 = arith.constant 0 : i32
    return %arg1, %c0_i32, %c0_i32_0 : i32, i32, i32
  }
  func.func @transform_3(%arg0: i32, %arg1: i32) -> (i32, i32, i32) {
    %c0_i32 = arith.constant 0 : i32
    %c0_i32_0 = arith.constant 0 : i32
    %c0_i32_1 = arith.constant 0 : i32
    return %arg1, %c0_i32, %c0_i32_0 : i32, i32, i32
  }
  func.func @transform_4(%arg0: i32, %arg1: i32) -> (i32, i32, i32) {
    %c0_i32 = arith.constant 0 : i32
    %c0_i32_0 = arith.constant 0 : i32
    %c0_i32_1 = arith.constant 0 : i32
    return %arg1, %c0_i32, %c0_i32_0 : i32, i32, i32
  }
  func.func @transform_5(%arg0: i32, %arg1: i32) -> (i32, i32, i32) {
    %c0_i32 = arith.constant 0 : i32
    %c0_i32_0 = arith.constant 0 : i32
    %c0_i32_1 = arith.constant 0 : i32
    return %arg1, %c0_i32, %c0_i32_0 : i32, i32, i32
  }
  func.func @transform_6(%arg0: i32, %arg1: i32) -> (i32, i32, i32) {
    %c0_i32 = arith.constant 0 : i32
    %c0_i32_0 = arith.constant 0 : i32
    %c0_i32_1 = arith.constant 0 : i32
    return %arg1, %c0_i32, %c0_i32_0 : i32, i32, i32
  }
  func.func @transform_7(%arg0: i32, %arg1: i32) -> (i32, i32, i32) {
    %c0_i32 = arith.constant 0 : i32
    %c0_i32_0 = arith.constant 0 : i32
    %c0_i32_1 = arith.constant 0 : i32
    return %arg1, %c0_i32, %c0_i32_0 : i32, i32, i32
  }
  func.func @transform_8(%arg0: i32, %arg1: i32) -> (i32, i32, i32) {
    %c0_i32 = arith.constant 0 : i32
    %c0_i32_0 = arith.constant 0 : i32
    %c0_i32_1 = arith.constant 0 : i32
    return %arg1, %c0_i32, %c0_i32_0 : i32, i32, i32
  }
  func.func @transform_9(%arg0: i32, %arg1: i32) -> (i32, i32, i32) {
    %c0_i32 = arith.constant 0 : i32
    %c0_i32_0 = arith.constant 0 : i32
    %c0_i32_1 = arith.constant 0 : i32
    return %arg1, %c0_i32, %c0_i32_0 : i32, i32, i32
  }
  func.func @transform_10(%arg0: i32, %arg1: i32) -> (i32, i32, i32) {
    %c0_i32 = arith.constant 0 : i32
    %c0_i32_0 = arith.constant 0 : i32
    %c0_i32_1 = arith.constant 0 : i32
    return %arg0, %c0_i32, %c0_i32_0 : i32, i32, i32
  }
}

</mosaic_0001>

<bundles_post_ra>
// kernel: tpu_custom_call.1
= control target key start
LH: loop header
LB: loop body
LE: loop exit
PB: predicated region body
PF: predicated region fallthrough
CT: control target
= control target key end

     0   :  { %s3701_s0 = inlined_call_operand.hbm [shape: f32[2,8,32], index: 0, kind: input, shape index: {}]   ;;  %s3702_s1 = inlined_call_operand.hbm [shape: f32[2,4,32], index: 1, kind: input, shape index: {}]   ;;  %s3703_s2 = inlined_call_operand.vmem [shape: f32[2,32,96], index: 2, kind: input, shape index: {}]   ;;  %s3704_s3 = inlined_call_operand.vmem [shape: f32[2,1,96], index: 3, kind: input, shape index: {}]   ;;  %s3705_s4 = inlined_call_operand.vmem [shape: f32[2,32,32], index: 4, kind: input, shape index: {}]   ;;  %s3706_s5 = inlined_call_operand.vmem [shape: f32[2,1,32], index: 5, kind: input, shape index: {}]   ;;  %s3707_s6 = inlined_call_operand.vmem [shape: f32[2,32,64], index: 6, kind: input, shape index: {}]   ;;  %s3708_s7 = inlined_call_operand.vmem [shape: f32[2,1,64], index: 7, kind: input, shape index: {}]   ;;  %s3709_s8 = inlined_call_operand.vmem [shape: f32[2,64,32], index: 8, kind: input, shape index: {}]   ;;  %s3710_s9 = inlined_call_operand.vmem [shape: f32[2,1,32], index: 9, kind: input, shape index: {}]   ;;  %s3711_s10 = inlined_call_operand.hbm [shape: f32[2,8,32], index: 10, kind: output, shape index: {}]  }
   0x1   :  { %3720 = sst [smem:[#allocation15_spill]] %s3701_s0 }
   0x2   :  { %3721 = sst [smem:[#allocation16_spill]] %s3702_s1 }
   0x3   :  { %3722 = sst [smem:[#allocation17_spill]] %s3703_s2 }
   0x4   :  { %3723 = sst [smem:[#allocation18_spill]] %s3705_s4 }
   0x5   :  { %3724 = sst [smem:[#allocation19_spill]] %s3710_s9 }
   0x6   :  { %3725 = sst [smem:[#allocation20_spill]] %s3711_s10 }
   0x7   :  { %15 = vsyncpa [#allocation5], 0 }
   0x8   :  { %16 = vsyncpa [#allocation8], 0 }
   0x9   :  { %18 = vsyncpa [#allocation8 + $0x1], 0 }
   0xa   :  { %19 = vsyncpa [#allocation6], 0  ;;  %s3222_s13 = smov 0   ;;  %s3224_s14 = smov 0  }
   0xb   :  { %s3226_s15 = smov 0   ;;  %s3228_s16 = smov 0  }
   0xc   :  { %s3230_s17 = smov 0   ;;  %s3232_s18 = smov 0  }
   0xd LB: > { %3726 = sst [smem:[#allocation13_spill]] %s3139_s17  ;;  %s3716_s19 = sadd.s32 4294967295, %s3143_s18   ;;  %s3143_s18 = sphi %s3232_s18, %s25_s18   ;;  %s3139_s17 = sphi %s3230_s17, %s3748_s17   ;;  %s3135_s16 = sphi %s3228_s16, %s3747_s16   ;;  %s3131_s15 = sphi %s3226_s15, %s3751_s15   ;;  %s3127_s14 = sphi %s3224_s14, %s3750_s14   ;;  %s3123_s13 = sphi %s3222_s13, %s3749_s13  }
   0xe   : > { %p83_p0 = scmp.ne.s32.totalorder %s3127_s14, %s3123_s13  ;;  %p3254_p1 = scmp.eq.s32.totalorder %s3716_s19, 0 }
   0xf   : > { %p2570_p2 = scmp.ge.s32.totalorder %s3143_s18, 1  ;;  %p328_p3 = scmp.lt.s32.totalorder %s3143_s18, 3 }
  0x10   : > { %s3727_s20 = scalar_select %p3254_p1, 1, 0 }
  0x11   : > { %p3262_p4 = por %p3254_p1, %p83_p0  ;;  %p3266_p5 = pnand %p2570_p2, %p328_p3 }
  0x12   : > { %s3145_s23 = smov [#allocation4]   ;;  %s34_s26 = sadd.s32 1, %s3139_s17 }
  0x13   : > { %s3728_s21 = scalar_select %p3262_p4, 1, 0 }
  0x14   : > { %s3729_s22 = scalar_select %p3266_p5, 1, 0 }
  0x15   : > { %s343_s24 = sshll.u32 %s3145_s23, 4  ;;  %p2875_p6 = pneg %p3266_p5  ;;  %s344_s24 = int_to_ptr.vmem [resolvable:$true] %s343_s24 }
  0x16   : > { %s3731_s0 = sld [smem:[#allocation15_spill]] }
  0x17   : > { %p3274_p7 = pnand %p2875_p6, %p3254_p1 }
  0x19   : > { %p3003_p9 = pneg %p3274_p7 }
  0x1c   : > { %s3001_s29 = scalar_lea.hbm %s3731_s0, 256 }
  0x1d   : > { %p3002_p8 = scmp.ne.s32.totalorder %s3731_s0, %s3001_s29  ;;  %p3008_p12 = scmp.lt.u32.totalorder %s3001_s29, %s3731_s0 }
  0x1f   : > { %p3004_p10 = pnand %p3003_p9, %p3002_p8 }
  0x21   : > { %p3005_p11 = pneg %p3004_p10 }
  0x23   : > { %p3010_p13 = pnand %p3008_p12, %p3005_p11 }
  0x25   : > { %3013 = shalt.err (!%p3010_p13)
}
  0x26   : > { %s3014_s23 = scalar_lea.vmem %s344_s24, 256  ;;  %p3022_p6 = scmp.lt.s32.totalorder %s344_s24, %s344_s24 }
  0x27   : > { %p3015_p0 = scmp.ne.s32.totalorder %s344_s24, %s3014_s23  ;;  %p3023_p4 = scmp.lt.s32.totalorder %s3014_s23, %s3014_s23 }
  0x29   : > { %p3017_p2 = pnand %p3015_p0, %p3003_p9  ;;  %p3024_p1 = por %p3023_p4, %p3022_p6 }
  0x2b   : > { %p3018_p3 = pneg %p3017_p2 }
  0x2d   : > { %p3025_p5 = pnand %p3024_p1, %p3018_p3 }
  0x2f   : > { %3028 = shalt.err (!%p3025_p5)
}
  0x30   : > { %s3146_s27 = smov 128   ;;  %s3147_s28 = smov 8  }
  0x31   : > { %2878 = dma.hbm_to_vmem [thread:$0]  (!%p3274_p7), %s3731_s0, 256, %s344_s24, [#allocation5], %s3146_s27, %s3146_s27, %s3147_s28  }
  0x32   : > { %p35_p4 = scmp.ge.s32.totalorder %s34_s26, 2  ;;  %s70_s11 = sadd.s32 1, %s3131_s15 }
  0x33   : > { %p77_p1 = scmp.ne.s32.totalorder %s3131_s15, %s3127_s14  ;;  %p78_p5 = scmp.eq.s32.totalorder %s3143_s18, 0 }
  0x34   : > { %s3753_s26 = smov (%p35_p4, %s34_s26), 0  ;;  %p2884_p9 = scmp.lt.s32.totalorder %s3143_s18, 2 }
  0x35   : > { %3732 = sst [smem:[#allocation14_spill]] %s3753_s26  ;;  %p79_p8 = por %p78_p5, %p77_p1 }
  0x36   : > { %s67_s12 = ssub.s32 %s3139_s17, %s3753_s26  ;;  %s357_s13 = sand.u32 1, %s3131_s15  }
  0x37   : > { %p68_p10 = scmp.eq.s32.totalorder %s67_s12, 0  ;;  %s2573_s23 = sshll.u32 %s357_s13, 2 }
  0x38   : > { %s2574_s19 = sshll.u32 %s3139_s17, 6  ;;  %s3733_s1 = sld [smem:[#allocation16_spill]] }
  0x39   : > { %s3307_s10 = scalar_select %p68_p10, %s3131_s15, %s70_s11  }
  0x3a   : > { %s361_s27 = scalar_lea.vmem [#allocation7], %s2573_s23  ;;  %p3314_p7 = pnand %p2884_p9, %p79_p8 }
  0x3b   : > { %s368_s28 = sshll.u32 %s361_s27, 4  ;;  %s358_s30 = scalar_lea.sflag [#allocation8], %s357_s13  ;;  %s3318_s28 = int_to_ptr.vmem [resolvable:$true] %s368_s28 }
  0x3c   : > { %p3031_p12 = pneg %p3314_p7 }
  0x3e   : > { %s3312_s24 = scalar_lea.hbm %s3733_s1, %s2574_s19  ;;  %s3034_s12 = scalar_lea.hbm %s3733_s1, 128 }
  0x3f   : > { %s3029_s11 = scalar_lea.hbm %s3312_s24, 64  ;;  %p3035_p2 = scmp.lt.u32.totalorder %s3312_s24, %s3733_s1 }
  0x40   : > { %p3030_p11 = scmp.ne.s32.totalorder %s3312_s24, %s3029_s11  ;;  %p3036_p3 = scmp.lt.u32.totalorder %s3034_s12, %s3029_s11 }
  0x41   : > { %p3038_p4 = scmp.lt.u32.totalorder %s3029_s11, %s3312_s24 }
  0x42   : > { %p3032_p13 = pnand %p3031_p12, %p3030_p11  ;;  %p3037_p6 = por %p3036_p3, %p3035_p2 }
  0x44   : > { %p3033_p0 = pneg %p3032_p13  ;;  %p3039_p1 = por %p3038_p4, %p3037_p6 }
  0x46   : > { %p3040_p5 = pnand %p3039_p1, %p3033_p0 }
  0x48   : > { %3043 = shalt.err (!%p3040_p5)
}
  0x49   : > { %s3044_s13 = scalar_lea.vmem %s3318_s28, 64  ;;  %s3148_s27 = smov [#allocation7]  }
  0x4a   : > { %p3045_p8 = scmp.ne.s32.totalorder %s3318_s28, %s3044_s13  ;;  %s3049_s9 = sshll.u32 %s3148_s27, 4  ;;  %s3050_s9 = int_to_ptr.vmem [resolvable:$false] %s3049_s9 }
  0x4b   : > { %s3051_s19 = scalar_lea.vmem %s3050_s9, 128  ;;  %p3052_p11 = scmp.lt.s32.totalorder %s3318_s28, %s3050_s9 }
  0x4c   : > { %p3047_p9 = pnand %p3045_p8, %p3031_p12  ;;  %p3053_p13 = scmp.lt.s32.totalorder %s3051_s19, %s3044_s13 }
  0x4e   : > { %p3048_p10 = pneg %p3047_p9  ;;  %p3054_p2 = por %p3053_p13, %p3052_p11 }
  0x50   : > { %p3055_p3 = pnand %p3054_p2, %p3048_p10 }
  0x52   : > { %3058 = shalt.err (!%p3055_p3)
}
  0x53   : > { %2882 = dma.hbm_to_vmem [thread:$0]  (!%p3314_p7), %s3312_s24, 64, %s3318_s28, %s358_s30  }
  0x54   : > { %p3735_p0 = scmp.ne.s32.totalorder %s3729_s22, 0 }
  0x55   : > { %p3736_p12 = scmp.ne.s32.totalorder (!%p3735_p0), %s3727_s20, 0 }
  0x56   : > { %433 = sbr.rel (%p3735_p0) target bundleno = 3630 (0xe2e), region = 60 }
  0x5d   : > { %3110 = dma.done.wait (%p3736_p12), [#allocation5], 256  }
  0x5e   : > { %3112 = vsyncadd (%p3736_p12), [#allocation5], 4294967040  ;;  %s439_s11 = sand.u32 1, %s3127_s14   ;;  %p3737_p6 = scmp.ne.s32.totalorder %s3728_s21, 0 }
  0x5f   : > { %s3352_s12 = sshll.u32 %s439_s11, 2  ;;  %s440_s23 = scalar_lea.sflag [#allocation8], %s439_s11 }
  0x60   : > { %3114 = dma.done.wait (%p3737_p6), %s440_s23, 64  }
  0x61   : > { %3116 = vsyncadd (%p3737_p6), %s440_s23, 4294967232  ;;  %p508_p7 = scmp.lt.s32.totalorder %s3135_s16, 1  ;;  %s3738_s2 = sld [smem:[#allocation17_spill]] }
  0x62   : > { %s3739_s4 = sld [smem:[#allocation18_spill]]  ;;  %s3740_s17 = sld [smem:[#allocation19_spill]] }
  0x63   : > { %s3361_s22 = scalar_select %p508_p7, %s3135_s16, 1 }
  0x64   : > { %p2586_p4 = scmp.ne.s32.totalorder %s3135_s16, 0 }
  0x65   : > { %s2629_s20 = sshll.u32 %s3361_s22, 5  ;;  %s523_s29 = scalar_lea.vmem %s3706_s5, %s3361_s22  ;;  %v545_v0 = vld [vmem:[#allocation4] sm:$0xff] (!%p2586_p4)  ;;  %vm547_vm0 = vcmask (!%p2586_p4), 261120   ;;  %v546_v1 = vld [vmem:[#allocation4 + $0x8] sm:$0xff] (!%p2586_p4) }
  0x66   : > { %s3385_s26 = scalar_lea.vmem %s3707_s6, %s2629_s20  ;;  %s531_s25 = scalar_lea.vmem %s3708_s7, %s3361_s22  ;;  %548 = vst.msk [vmem:[#allocation2] sm:$0xff] (!%p2586_p4), %vm547_vm0, %v545_v0  ;;  %549 = vst.msk [vmem:[#allocation2 + $0x8] sm:$0xff] (!%p2586_p4), %vm547_vm0, %v546_v1 }
  0x67   : > { %s3371_s21 = scalar_lea.vmem %s3738_s2, %s2629_s20  ;;  %s2632_s13 = sshll.u32 %s3361_s22, 6 }
  0x68   : > { %s3376_s19 = scalar_lea.vmem %s3739_s4, %s2629_s20  ;;  %s3395_s27 = scalar_lea.vmem %s3709_s8, %s2632_s13 }
  0x69   : > { %s539_s11 = scalar_lea.vmem %s3740_s17, %s3361_s22  ;;  %544 = sbr.rel (%p2586_p4) target bundleno = 112 (0x70), region = 72 }
  0x70 PF: > { %v3402_v2 = vld [vmem:[#allocation2] sm:$0xff]  ;;  %vm553_vm1 = vcmask 261120   ;;  %v3404_v3 = vld [vmem:[#allocation2 + $0x8] sm:$0xff]  ;;  %v595_v18 = vld [vmem:[%s3371_s21 + $0x10] sm:$0xff]  ;;  %v581_v24 = vlaneseq  ;;  %s3741_s0 = scalar_lea.vmem [#allocation7], %s3352_s12  ;;  %v3149_v43 = vmov 0.0   ;;  %s3742_s4 = scalar_lea.vmem %s3704_s3, %s3361_s22 }
  0x71   : > { %v554_v4 = vsel %vm553_vm1, %v3402_v2, 0.0  ;;  %v557_v5 = vsel %vm553_vm1, %v3404_v3, 0.0  ;;  %v593_v16 = vld [vmem:[%s3371_s21] sm:$0xff]  ;;  %v594_v17 = vld [vmem:[%s3371_s21 + $0x8] sm:$0xff]  ;;  %v596_v20 = vld [vmem:[%s3371_s21 + $0x18] sm:$0xff]  ;;  %2714 = vmatprep.subr.mxu0 %v3149_v43  ;;  %vm3150_vm2 = vmmov 0  }
  0x72   : > { %555 = vadd.xlane.f32.xlu0 %v554_v4  ;;  %v2825_v19 = vpack.c.bf16 %v594_v17, %v593_v16  ;;  %v2829_v21 = vpack.c.bf16 %v596_v20, %v595_v18  ;;  %v3418_v28 = vshrl.u32 %v581_v24, 7  ;;  %v3423_v31 = vld [vmem:[%s3741_s0] sm:$0xf]  ;;  %2716 = vmatprep.mubr.msk.f32.mxu0 %vm3150_vm2, %v3149_v43  ;;  %v2587_v44 = vld [vmem:[%s3742_s4] ss:$0 sm:$0xff]  ;;  %s3151_s17 = smov 96  }
  0x73   : > { %vm688_vm3 = vcmask 64512   ;;  %s3152_s12 = smov 64   ;;  %s3153_s20 = smov 88   ;;  %vm1354_vm4 = vcmask 130112   ;;  %vm1695_vm5 = vcmask 195712   ;;  %vm2036_vm6 = vcmask 261312  }
  0x74   : > { %2826 = vmatprep.subr.bf16.mxu1 %v2825_v19  ;;  %v583_v30 = vsub.s32 0, %v3418_v28  ;;  %v589_v32 = vsub.s32 1, %v3418_v28  ;;  %s3154_s30 = smov 120   ;;  %s3155_s21 = smov 56   ;;  %vm2293_vm7 = vcmask 523264  }
  0x75   : > { %2828 = vmatpush3.bf16.msra.mxu1 %v2825_v19  ;;  %s3156_s23 = smov 80   ;;  %s3157_s24 = smov 112  }
  0x76   : > { %558 = vadd.xlane.f32.xlu0 %v557_v5  ;;  %2830 = vmatprep.subr.bf16.mxu1 %v2829_v21  ;;  %v584_v33 = vrot.slane %v3423_v31, %v583_v30  ;;  %v590_v36 = vrot.slane %v3423_v31, %v589_v32  ;;  %s3158_s28 = smov 48   ;;  %s3159_s13 = smov 72  }
  0x77   : > { %s3160_s9 = smov 104   ;;  %s3161_s0 = smov 40  }
  0x78   : > { %s3162_s1 = smov 8   ;;  %s3163_s2 = smov 16  }
  0x79   : > { %2832 = vmatpush3.bf16.msra.mxu1 %v2829_v21  ;;  %s3164_s4 = smov 24   ;;  %p2623_p1 = scmp.eq.s32.totalorder %s3135_s16, 1 }
  0x7a   : > { %2704 = vmatprep.subr.mxu1 %v3149_v43 }
  0xff   : > { %v556_v6 = vpop.xlane.xlu0 %555 }
 0x100   : > { %v561_v7 = vmul.f32 0.03125, %v556_v6 }
 0x102   : > { %v563_v8 = vsub.f32 %v3402_v2, %v561_v7 }
 0x103   : > { %v559_v9 = vpop.xlane.xlu0 %558 }
 0x104   : > { %v562_v10 = vmul.f32 0.03125, %v559_v9  ;;  %v565_v11 = vmul.f32 %v563_v8, %v563_v8 }
 0x106   : > { %v564_v12 = vsub.f32 %v3404_v3, %v562_v10  ;;  %v567_v13 = vsel %vm553_vm1, %v565_v11, 0.0 }
 0x107   : > { %568 = vadd.xlane.f32.xlu1 %v567_v13 }
 0x108   : > { %v566_v14 = vmul.f32 %v564_v12, %v564_v12 }
 0x10a   : > { %v570_v15 = vsel %vm553_vm1, %v566_v14, 0.0 }
 0x10b   : > { %571 = vadd.xlane.f32.xlu1 %v570_v15 }
 0x194   : > { %v569_v22 = vpop.xlane.xlu1 %568 }
 0x195   : > { %v573_v23 = vmul.f32 0.03125, %v569_v22 }
 0x197   : > { %v575_v25 = vadd.f32 1e-06, %v573_v23 }
 0x198   : > { %v572_v26 = vpop.xlane.xlu1 %571 }
 0x199   : > { %2957 = vrsqrt.f32 %v575_v25  ;;  %v574_v27 = vmul.f32 0.03125, %v572_v26 }
 0x19b   : > { %v576_v29 = vadd.f32 1e-06, %v574_v27 }
 0x19d   : > { %2959 = vrsqrt.f32 %v576_v29 }
 0x1a3   : > { %v2958_v34 = vpop.eup %2957 }
 0x1a4   : > { %v579_v35 = vmul.f32 %v2958_v34, %v563_v8 }
 0x1a6   : > { %v585_v37 = vmul.f32 %v584_v33, %v579_v35 }
 0x1a7   : > { %v2960_v38 = vpop.eup %2959 }
 0x1a8   : > { %v580_v39 = vmul.f32 %v2960_v38, %v564_v12  ;;  %v591_v40 = vadd.f32 %v590_v36, %v585_v37 }
 0x1aa   : > { %v586_v41 = vmul.f32 %v584_v33, %v580_v39  ;;  %2701 = vmatprep.mubr.msk.f32.mxu1 %vm553_vm1, %v591_v40 }
 0x1ac   : > { %v592_v42 = vadd.f32 %v590_v36, %v586_v41 }
 0x1ae   : > { %2702 = vmatmul.mubr.msk.f32.vlgmr.msra.gmra.mrb[0].mxu1 %vm553_vm1, %v592_v42 }
 0x1af   : > { %2706 = vmatprep.mubr.msk.f32.mxu1 %vm3150_vm2, %v3149_v43 }
 0x281   : > { %v2703_v45 = vpop.f32.mrb[0].mxu1 }
 0x282   : > { %v3441_v46 = vadd.f32 %v2703_v45, %v2587_v44  ;;  %v676_v47 = vpop.f32.mrb[1].mxu1 }
 0x283   : > { %v3443_v48 = vadd.f32 %v2587_v44, %v676_v47 }
 0x284   : > { %764 = vrot.lane.b32.xlu1 %v3441_v46, %s3151_s17 }
 0x285   : > { %686 = vrot.lane.b32.xlu0 %v3443_v48, %s3151_s17 }
 0x2f6   : > { %v765_v50 = vpop.permute.xlu1 %764 }
 0x2f7   : > { %v687_v49 = vpop.permute.xlu0 %686 }
 0x2f8   : > { %2705 = vmatpush3.xpose.msk.msra.mxu1 %vm688_vm3, %v687_v49 }
 0x2f9   : > { %2709 = vmatprep.subr.mxu1 %v3149_v43 }
 0x2fb   : > { %2707 = vmatmul.mubr.msk.f32.vlgmr.msra.gmra.mrb[2].mxu1 %vm688_vm3, %v3443_v48 }
 0x2fc   : > { %2710 = vmatpush3.xpose.msk.msra.mxu1 %vm688_vm3, %v765_v50  ;;  %2711 = vmatprep.mubr.msk.f32.mxu1 %vm3150_vm2, %v3149_v43 }
 0x2fd   : > { %2719 = vmatprep.subr.mxu1 %v3149_v43 }
 0x2ff   : > { %2712 = vmatmul.mubr.msk.f32.vlgmr.msra.gmra.mrb[4].mxu1 %vm688_vm3, %v3441_v46 }
 0x300   : > { %2721 = vmatprep.mubr.msk.f32.mxu1 %vm3150_vm2, %v3149_v43 }
 0x3ce   : > { %v759_v51 = vpop.f32.mrb[2].mxu1 }
 0x3cf   : > { %v2708_v52 = vpop.f32.mrb[3].mxu1  ;;  %v840_v53 = vsel %vm688_vm3, %v759_v51, -inf }
 0x3d0   : > { %841 = vmax.xlane.f32.xlu1 %v840_v53 }
 0x3d2   : > { %v836_v54 = vpop.f32.mrb[4].mxu1 }
 0x3d3   : > { %v2713_v55 = vpop.f32.mrb[5].mxu1  ;;  %v843_v56 = vsel %vm688_vm3, %v836_v54, -inf }
 0x3d4   : > { %844 = vmax.xlane.f32.xlu0 %v843_v56 }
 0x3e1   : > { %936 = vrot.lane.b32.xlu1 %v3441_v46, %s3152_s12 }
 0x3e5   : > { %1018 = vrot.lane.b32.xlu1 %v3443_v48, %s3153_s20 }
 0x3e9   : > { %1096 = vrot.lane.b32.xlu1 %v3441_v46, %s3153_s20 }
 0x3ea   : > { %860 = vrot.lane.b32.xlu0 %v3443_v48, %s3152_s12 }
 0x3ed   : > { %1094 = vrot.lane.b32.xlu1 %v3441_v46, %s3154_s30 }
 0x3ee   : > { %1016 = vrot.lane.b32.xlu0 %v3443_v48, %s3154_s30 }
 0x3f1   : > { %1268 = vrot.lane.b32.xlu1 %v3441_v46, %s3155_s21 }
 0x3f2   : > { %1192 = vrot.lane.b32.xlu0 %v3443_v48, %s3155_s21 }
 0x3f5   : > { %1437 = vrot.lane.b32.xlu1 %v3441_v46, %s3156_s23 }
 0x45d   : > { %v842_v57 = vpop.xlane.xlu1 %841 }
 0x45e   : > { %v846_v58 = vsub.f32 %v759_v51, %v842_v57 }
 0x460   : > { %v848_v59 = vmul.f32 1.442695, %v846_v58 }
 0x461   : > { %v937_v60 = vpop.permute.xlu1 %936  ;;  %v845_v61 = vpop.xlane.xlu0 %844 }
 0x462   : > { %2961 = vpow2.f32 %v848_v59  ;;  %v847_v62 = vsub.f32 %v836_v54, %v845_v61  ;;  %2720 = vmatpush3.msra.mxu1 %v937_v60 }
 0x463   : > { %2729 = vmatprep.subr.mxu1 %v3149_v43 }
 0x464   : > { %v850_v63 = vmul.f32 1.442695, %v847_v62 }
 0x465   : > { %v1019_v0 = vpop.permute.xlu1 %1018  ;;  %v861_v1 = vpop.permute.xlu0 %860 }
 0x466   : > { %2963 = vpow2.f32 %v850_v63  ;;  %2715 = vmatpush3.msra.mxu0 %v861_v1 }
 0x467   : > { %2724 = vmatprep.subr.mxu0 %v3149_v43 }
 0x469   : > { %v1097_v4 = vpop.permute.xlu1 %1096  ;;  %v1017_v5 = vpop.permute.xlu0 %1016 }
 0x46c   : > { %v3473_v6 = vpop.eup %2961 }
 0x46d   : > { %2717 = vmatmul.mubr.msk.f32.vlgmr.msra.gmra.mrb[0].mxu0 %vm688_vm3, %v3473_v6  ;;  %v1095_v7 = vpop.permute.xlu1 %1094  ;;  %v1193_v9 = vpop.permute.xlu0 %1192 }
 0x46e   : > { %2725 = vmatpush3.xpose.msk.msra.mxu0 %vm688_vm3, %v1019_v0  ;;  %2726 = vmatprep.mubr.msk.f32.mxu0 %vm3150_vm2, %v3149_v43 }
 0x46f   : > { %2734 = vmatprep.subr.mxu0 %v3149_v43 }
 0x470   : > { %v3481_v8 = vpop.eup %2963 }
 0x471   : > { %2722 = vmatmul.mubr.msk.f32.vlgmr.msra.gmra.mrb[6].mxu1 %vm688_vm3, %v3481_v8  ;;  %2727 = vmatmul.mubr.msk.f32.vlgmr.msra.gmra.mrb[2].mxu0 %vm688_vm3, %v1017_v5  ;;  %v1269_v10 = vpop.permute.xlu1 %1268 }
 0x472   : > { %2730 = vmatpush3.xpose.msk.msra.mxu1 %vm688_vm3, %v1097_v4  ;;  %2735 = vmatpush3.msra.mxu0 %v1193_v9 }
 0x473   : > { %2731 = vmatprep.mubr.msk.f32.mxu1 %vm3150_vm2, %v3149_v43  ;;  %2739 = vmatprep.subr.mxu1 %v3149_v43 }
 0x474   : > { %2736 = vmatprep.mubr.msk.f32.mxu0 %vm3150_vm2, %v3149_v43  ;;  %2744 = vmatprep.subr.mxu0 %v3149_v43 }
 0x475   : > { %2732 = vmatmul.mubr.msk.f32.vlgmr.msra.gmra.mrb[8].mxu1 %vm688_vm3, %v1095_v7  ;;  %v1438_v21 = vpop.permute.xlu1 %1437 }
 0x476   : > { %2740 = vmatpush3.msra.mxu1 %v1269_v10  ;;  %2741 = vmatprep.mubr.msk.f32.mxu1 %vm3150_vm2, %v3149_v43 }
 0x477   : > { %2749 = vmatprep.subr.mxu1 %v3149_v43 }
 0x540   : > { %v3497_v11 = vpop.f32.mrb[0].mxu0 }
 0x541   : > { %v2718_v12 = vpop.f32.mrb[1].mxu0 }
 0x544   : > { %v3499_v13 = vpop.f32.mrb[6].mxu1  ;;  %v1090_v14 = vpop.f32.mrb[2].mxu0 }
 0x545   : > { %v2723_v15 = vpop.f32.mrb[7].mxu1  ;;  %v2728_v16 = vpop.f32.mrb[3].mxu0  ;;  %v1172_v17 = vsel %vm688_vm3, %v1090_v14, -inf }
 0x546   : > { %1173 = vmax.xlane.f32.xlu0 %v1172_v17 }
 0x548   : > { %v1168_v18 = vpop.f32.mrb[8].mxu1 }
 0x549   : > { %v2733_v19 = vpop.f32.mrb[9].mxu1  ;;  %v1175_v20 = vsel %vm688_vm3, %v1168_v18, -inf }
 0x54a   : > { %1176 = vmax.xlane.f32.xlu1 %v1175_v20 }
 0x55b   : > { %1435 = vrot.lane.b32.xlu1 %v3441_v46, %s3157_s24 }
 0x55c   : > { %1359 = vrot.lane.b32.xlu0 %v3443_v48, %s3156_s23 }
 0x55f   : > { %1609 = vrot.lane.b32.xlu1 %v3441_v46, %s3158_s28 }
 0x560   : > { %1357 = vrot.lane.b32.xlu0 %v3443_v48, %s3157_s24 }
 0x563   : > { %1778 = vrot.lane.b32.xlu1 %v3441_v46, %s3159_s13 }
 0x564   : > { %1533 = vrot.lane.b32.xlu0 %v3443_v48, %s3158_s28 }
 0x5d3   : > { %v1174_v22 = vpop.xlane.xlu0 %1173 }
 0x5d4   : > { %v1178_v23 = vsub.f32 %v1090_v14, %v1174_v22 }
 0x5d6   : > { %v1180_v24 = vmul.f32 1.442695, %v1178_v23 }
 0x5d7   : > { %v1177_v25 = vpop.xlane.xlu1 %1176  ;;  %v1360_v29 = vpop.permute.xlu0 %1359 }
 0x5d8   : > { %2965 = vpow2.f32 %v1180_v24  ;;  %v1179_v26 = vsub.f32 %v1168_v18, %v1177_v25 }
 0x5da   : > { %v1182_v27 = vmul.f32 1.442695, %v1179_v26  ;;  %v852_v26 = vsel %vm688_vm3, %v3473_v6, 0.0 }
 0x5db   : > { %v1358_v30 = vpop.permute.xlu0 %1357  ;;  %v1436_v33 = vpop.permute.xlu1 %1435 }
 0x5dc   : > { %2967 = vpow2.f32 %v1182_v27 }
 0x5df   : > { %v1534_v35 = vpop.permute.xlu0 %1533  ;;  %v1610_v36 = vpop.permute.xlu1 %1609 }
 0x5e2   : > { %v3511_v32 = vpop.eup %2965 }
 0x5e3   : > { %2737 = vmatmul.mubr.msk.f32.vlgmr.msra.gmra.mrb[4].mxu0 %vm688_vm3, %v3511_v32  ;;  %v1779_v50 = vpop.permute.xlu1 %1778 }
 0x5e4   : > { %2745 = vmatpush3.xpose.msk.msra.mxu0 %vm688_vm3, %v1360_v29  ;;  %2746 = vmatprep.mubr.msk.f32.mxu0 %vm3150_vm2, %v3149_v43  ;;  %v855_v29 = vsel %vm688_vm3, %v3481_v8, 0.0 }
 0x5e5   : > { %2754 = vmatprep.subr.mxu0 %v3149_v43 }
 0x5e6   : > { %v3519_v34 = vpop.eup %2967 }
 0x5e7   : > { %2742 = vmatmul.mubr.msk.f32.vlgmr.msra.gmra.mrb[10].mxu1 %vm688_vm3, %v3519_v34  ;;  %2747 = vmatmul.mubr.msk.f32.vlgmr.msra.gmra.mrb[6].mxu0 %vm688_vm3, %v1358_v30  ;;  %v1187_v15 = vsel %vm688_vm3, %v3519_v34, 0.0 }
 0x5e8   : > { %2750 = vmatpush3.xpose.msk.msra.mxu1 %vm688_vm3, %v1438_v21  ;;  %2755 = vmatpush3.msra.mxu0 %v1534_v35 }
 0x5e9   : > { %2751 = vmatprep.mubr.msk.f32.mxu1 %vm3150_vm2, %v3149_v43  ;;  %2759 = vmatprep.subr.mxu1 %v3149_v43 }
 0x5ea   : > { %2756 = vmatprep.mubr.msk.f32.mxu0 %vm3150_vm2, %v3149_v43  ;;  %2764 = vmatprep.subr.mxu0 %v3149_v43 }
 0x5eb   : > { %2752 = vmatmul.mubr.msk.f32.vlgmr.msra.gmra.mrb[12].mxu1 %vm688_vm3, %v1436_v33 }
 0x5ec   : > { %2760 = vmatpush3.msra.mxu1 %v1610_v36  ;;  %2761 = vmatprep.mubr.msk.f32.mxu1 %vm3150_vm2, %v3149_v43 }
 0x5ed   : > { %2769 = vmatprep.subr.mxu1 %v3149_v43 }
 0x6b6   : > { %v3535_v37 = vpop.f32.mrb[4].mxu0 }
 0x6b7   : > { %v2738_v38 = vpop.f32.mrb[5].mxu0 }
 0x6ba   : > { %v3537_v39 = vpop.f32.mrb[10].mxu1  ;;  %v1431_v40 = vpop.f32.mrb[6].mxu0 }
 0x6bb   : > { %v2743_v41 = vpop.f32.mrb[11].mxu1  ;;  %v2748_v42 = vpop.f32.mrb[7].mxu0  ;;  %v1513_v44 = vsel %vm688_vm3, %v1431_v40, -inf }
 0x6bc   : > { %1514 = vmax.xlane.f32.xlu0 %v1513_v44 }
 0x6be   : > { %v1509_v45 = vpop.f32.mrb[12].mxu1 }
 0x6bf   : > { %v2753_v47 = vpop.f32.mrb[13].mxu1  ;;  %v1516_v49 = vsel %vm688_vm3, %v1509_v45, -inf }
 0x6c0   : > { %1517 = vmax.xlane.f32.xlu1 %v1516_v49 }
 0x6d1   : > { %1776 = vrot.lane.b32.xlu1 %v3441_v46, %s3160_s9 }
 0x6d2   : > { %1700 = vrot.lane.b32.xlu0 %v3443_v48, %s3159_s13 }
 0x6d6   : > { %1698 = vrot.lane.b32.xlu0 %v3443_v48, %s3160_s9 }
 0x749   : > { %v1515_v51 = vpop.xlane.xlu0 %1514 }
 0x74a   : > { %v1519_v52 = vsub.f32 %v1431_v40, %v1515_v51 }
 0x74c   : > { %v1521_v53 = vmul.f32 1.442695, %v1519_v52 }
 0x74d   : > { %v1518_v54 = vpop.xlane.xlu1 %1517  ;;  %v1701_v57 = vpop.permute.xlu0 %1700 }
 0x74e   : > { %2969 = vpow2.f32 %v1521_v53  ;;  %v1520_v55 = vsub.f32 %v1509_v45, %v1518_v54 }
 0x750   : > { %v1523_v56 = vmul.f32 1.442695, %v1520_v55  ;;  %v2041_v55 = vld [vmem:[%s3376_s19] sm:$0xff] }
 0x751   : > { %v1699_v60 = vpop.permute.xlu0 %1698  ;;  %v1777_v61 = vpop.permute.xlu1 %1776 }
 0x752   : > { %2971 = vpow2.f32 %v1523_v56  ;;  %v2042_v56 = vld [vmem:[%s3376_s19 + $0x8] sm:$0xff] }
 0x758   : > { %v2970_v58 = vpop.eup %2969 }
 0x759   : > { %2757 = vmatmul.mubr.msk.f32.vlgmr.msra.gmra.mrb[8].mxu0 %vm688_vm3, %v2970_v58  ;;  %v1525_v14 = vsel %vm688_vm3, %v2970_v58, 0.0  ;;  %v2044_v58 = vld [vmem:[%s3376_s19 + $0x18] sm:$0xff] }
 0x75a   : > { %2765 = vmatpush3.xpose.msk.msra.mxu0 %vm688_vm3, %v1701_v57  ;;  %2766 = vmatprep.mubr.msk.f32.mxu0 %vm3150_vm2, %v3149_v43  ;;  %v2833_v57 = vpack.c.bf16 %v2042_v56, %v2041_v55  ;;  %v2287_v56 = vld [vmem:[%s3395_s27 + $0x10] sm:$0xff] }
 0x75b   : > { %2774 = vmatprep.subr.mxu0 %v3149_v43 }
 0x75c   : > { %v2972_v59 = vpop.eup %2971 }
 0x75d   : > { %2762 = vmatmul.mubr.msk.f32.vlgmr.msra.gmra.mrb[14].mxu1 %vm688_vm3, %v2972_v59  ;;  %2767 = vmatmul.mubr.msk.f32.vlgmr.msra.gmra.mrb[10].mxu0 %vm688_vm3, %v1699_v60  ;;  %v1528_v16 = vsel %vm688_vm3, %v2972_v59, 0.0 }
 0x75e   : > { %2770 = vmatpush3.xpose.msk.msra.mxu1 %vm688_vm3, %v1779_v50  ;;  %2771 = vmatprep.mubr.msk.f32.mxu1 %vm3150_vm2, %v3149_v43 }
 0x75f   : > { %2779 = vmatprep.subr.mxu1 %v3149_v43  ;;  %2776 = vmatprep.mubr.msk.f32.mxu0 %vm3150_vm2, %v3149_v43 }
 0x761   : > { %2772 = vmatmul.mubr.msk.f32.vlgmr.msra.gmra.mrb[16].mxu1 %vm688_vm3, %v1777_v61 }
 0x762   : > { %2781 = vmatprep.mubr.msk.f32.mxu1 %vm3150_vm2, %v3149_v43  ;;  %v1184_v43 = vsel %vm688_vm3, %v3511_v32, 0.0 }
 0x82c   : > { %v3561_v62 = vpop.f32.mrb[8].mxu0 }
 0x82d   : > { %v2758_v63 = vpop.f32.mrb[9].mxu0 }
 0x830   : > { %v3563_v0 = vpop.f32.mrb[14].mxu1  ;;  %v1772_v1 = vpop.f32.mrb[10].mxu0 }
 0x831   : > { %v2763_v4 = vpop.f32.mrb[15].mxu1  ;;  %v2768_v5 = vpop.f32.mrb[11].mxu0  ;;  %v1854_v7 = vsel %vm688_vm3, %v1772_v1, -inf }
 0x832   : > { %1855 = vmax.xlane.f32.xlu0 %v1854_v7 }
 0x834   : > { %v1850_v9 = vpop.f32.mrb[16].mxu1 }
 0x835   : > { %v2773_v10 = vpop.f32.mrb[17].mxu1  ;;  %v1857_v12 = vsel %vm688_vm3, %v1850_v9, -inf }
 0x836   : > { %1858 = vmax.xlane.f32.xlu1 %v1857_v12 }
 0x847   : > { %1950 = vrot.lane.b32.xlu1 %v3441_v46, %s3161_s0 }
 0x848   : > { %1874 = vrot.lane.b32.xlu0 %v3443_v48, %s3161_s0 }
 0x867   : > { %1185 = vadd.xlane.f32.xlu0 %v1184_v43 }
 0x86b   : > { %1526 = vadd.xlane.f32.xlu0 %v1525_v14  ;;  %1188 = vadd.xlane.f32.xlu1 %v1187_v15  ;;  %v2616_v14 = vld [vmem:[%s523_s29] ss:$0 sm:$0xff] }
 0x86f   : > { %1529 = vadd.xlane.f32.xlu0 %v1528_v16 }
 0x8bf   : > { %v1856_v17 = vpop.xlane.xlu0 %1855 }
 0x8c0   : > { %v1860_v18 = vsub.f32 %v1772_v1, %v1856_v17 }
 0x8c2   : > { %v1862_v19 = vmul.f32 1.442695, %v1860_v18 }
 0x8c3   : > { %v1875_v46 = vpop.permute.xlu0 %1874  ;;  %v1859_v20 = vpop.xlane.xlu1 %1858 }
 0x8c4   : > { %2973 = vpow2.f32 %v1862_v19  ;;  %v1861_v48 = vsub.f32 %v1850_v9, %v1859_v20  ;;  %2775 = vmatpush3.msra.mxu0 %v1875_v46 }
 0x8c5   : > { %2834 = vmatprep.subr.bf16.mxu0 %v2833_v57 }
 0x8c6   : > { %v1864_v21 = vmul.f32 1.442695, %v1861_v48 }
 0x8c7   : > { %v1951_v22 = vpop.permute.xlu1 %1950 }
 0x8c8   : > { %2975 = vpow2.f32 %v1864_v21  ;;  %2780 = vmatpush3.msra.mxu1 %v1951_v22 }
 0x8ce   : > { %v2974_v23 = vpop.eup %2973 }
 0x8cf   : > { %2777 = vmatmul.mubr.msk.f32.vlgmr.msra.gmra.mrb[12].mxu0 %vm688_vm3, %v2974_v23  ;;  %v1866_v24 = vsel %vm688_vm3, %v2974_v23, 0.0 }
 0x8d0   : > { %1867 = vadd.xlane.f32.xlu0 %v1866_v24  ;;  %2836 = vmatpush3.bf16.msra.mxu0 %v2833_v57  ;;  %v2288_v57 = vld [vmem:[%s3395_s27 + $0x18] sm:$0xff] }
 0x8d2   : > { %v2976_v25 = vpop.eup %2975 }
 0x8d3   : > { %2782 = vmatmul.mubr.msk.f32.vlgmr.msra.gmra.mrb[18].mxu1 %vm688_vm3, %v2976_v25  ;;  %v1869_v27 = vsel %vm688_vm3, %v2976_v25, 0.0 }
 0x8d4   : > { %853 = vadd.xlane.f32.xlu0 %v852_v26  ;;  %1870 = vadd.xlane.f32.xlu1 %v1869_v27 }
 0x8d8   : > { %856 = vadd.xlane.f32.xlu1 %v855_v29  ;;  %v2175_v29 = vld [vmem:[%s3385_s26] sm:$0xff] }
 0x8f4   : > { %v1186_v30 = vpop.xlane.xlu0 %1185 }
 0x8f5   : > { %2977 = vrcp.f32 %v1186_v30  ;;  %v2176_v30 = vld [vmem:[%s3385_s26 + $0x8] sm:$0xff] }
 0x8f8   : > { %v1527_v32 = vpop.xlane.xlu0 %1526  ;;  %v1189_v33 = vpop.xlane.xlu1 %1188 }
 0x8f9   : > { %2979 = vrcp.f32 %v1189_v33  ;;  %v2177_v33 = vld [vmem:[%s3385_s26 + $0x10] sm:$0xff] }
 0x8fa   : > { %2981 = vrcp.f32 %v1527_v32  ;;  %v2841_v32 = vpack.c.bf16 %v2176_v30, %v2175_v29 }
 0x8fc   : > { %v1530_v34 = vpop.xlane.xlu0 %1529  ;;  %2842 = vmatprep.subr.bf16.mxu1 %v2841_v32 }
 0x8fd   : > { %2983 = vrcp.f32 %v1530_v34  ;;  %2844 = vmatpush3.bf16.msra.mxu1 %v2841_v32  ;;  %v2178_v34 = vld [vmem:[%s3385_s26 + $0x18] sm:$0xff] }
 0x8ff   : > { %v2978_v35 = vpop.eup %2977 }
 0x900   : > { %v1344_v36 = vmul.f32 %v2978_v35, %v3535_v37  ;;  %v2845_v35 = vpack.c.bf16 %v2178_v34, %v2177_v33 }
 0x902   : > { %1348 = vrot.lane.b32.xlu0 %v1344_v36, %s3162_s1  ;;  %2846 = vmatprep.subr.bf16.mxu1 %v2845_v35 }
 0x903   : > { %v2980_v6 = vpop.eup %2979  ;;  %2848 = vmatpush3.bf16.msra.mxu1 %v2845_v35 }
 0x904   : > { %v1345_v38 = vmul.f32 %v2980_v6, %v3537_v39  ;;  %v2982_v40 = vpop.eup %2981 }
 0x905   : > { %v1685_v8 = vmul.f32 %v2982_v40, %v3561_v62 }
 0x906   : > { %1350 = vrot.lane.b32.xlu1 %v1345_v38, %s3162_s1 }
 0x907   : > { %v2984_v41 = vpop.eup %2983 }
 0x908   : > { %v1686_v42 = vmul.f32 %v2984_v41, %v3563_v0 }
 0x90a   : > { %1689 = vrot.lane.b32.xlu1 %v1685_v8, %s3163_s2 }
 0x90e   : > { %1691 = vrot.lane.b32.xlu1 %v1686_v42, %s3163_s2  ;;  %v2165_v42 = vsub.s32 2, %v3418_v28 }
 0x95d   : > { %v1868_v44 = vpop.xlane.xlu0 %1867 }
 0x961   : > { %v854_v45 = vpop.xlane.xlu0 %853  ;;  %v1871_v37 = vpop.xlane.xlu1 %1870 }
 0x962   : > { %2985 = vrcp.f32 %v854_v45  ;;  %v2166_v45 = vrot.slane %v3423_v31, %v2165_v42 }
 0x965   : > { %v857_v47 = vpop.xlane.xlu1 %856 }
 0x966   : > { %2987 = vrcp.f32 %v857_v47 }
 0x967   : > { %2989 = vrcp.f32 %v1868_v44  ;;  %v2171_v44 = vsub.s32 3, %v3418_v28 }
 0x968   : > { %2991 = vrcp.f32 %v1871_v37 }
 0x96c   : > { %v2986_v49 = vpop.eup %2985 }
 0x96d   : > { %v1012_v39 = vmul.f32 %v2986_v49, %v3497_v11  ;;  %v2172_v49 = vrot.slane %v3423_v31, %v2171_v44  ;;  %v2853_v31 = vpack.c.bf16 %v2288_v57, %v2287_v56 }
 0x96f   : > { %1014 = vst.msk [vmem:[#allocation3] sm:$0xff] %vm688_vm3, %v1012_v39 }
 0x970   : > { %v2988_v50 = vpop.eup %2987 }
 0x971   : > { %v1013_v51 = vmul.f32 %v2988_v50, %v3499_v13  ;;  %v2043_v13 = vld [vmem:[%s3376_s19 + $0x10] sm:$0xff]  ;;  %v2990_v60 = vpop.eup %2989 }
 0x972   : > { %v2837_v59 = vpack.c.bf16 %v2044_v58, %v2043_v13  ;;  %v2992_v0 = vpop.eup %2991  ;;  %v2289_v13 = vld [vmem:[%s3395_s27 + $0x20] sm:$0xff]  ;;  %v2290_v58 = vld [vmem:[%s3395_s27 + $0x28] sm:$0xff] }
 0x973   : > { %1015 = vst.msk [vmem:[#allocation3 + $0x8] sm:$0xff] %vm688_vm3, %v1013_v51 }
 0x974   : > { %v1349_v52 = vpop.permute.xlu0 %1348  ;;  %2838 = vmatprep.subr.bf16.mxu0 %v2837_v59 }
 0x975   : > { %1355 = vst.msk [vmem:[#allocation3] sm:$0xff] %vm1354_vm4, %v1349_v52  ;;  %2840 = vmatpush3.bf16.msra.mxu0 %v2837_v59  ;;  %v2857_v59 = vpack.c.bf16 %v2290_v58, %v2289_v13 }
 0x978   : > { %v1351_v53 = vpop.permute.xlu1 %1350 }
 0x979   : > { %1356 = vst.msk [vmem:[#allocation3 + $0x8] sm:$0xff] %vm1354_vm4, %v1351_v53 }
 0x97c   : > { %v1690_v54 = vpop.permute.xlu1 %1689 }
 0x97d   : > { %1696 = vst.msk [vmem:[#allocation3] sm:$0xff] %vm1695_vm5, %v1690_v54  ;;  %v2285_v54 = vld [vmem:[%s3395_s27] sm:$0xff] }
 0x980   : > { %v1692_v11 = vpop.permute.xlu1 %1691 }
 0x981   : > { %1697 = vst.msk [vmem:[#allocation3 + $0x8] sm:$0xff] %vm1695_vm5, %v1692_v11  ;;  %v2286_v11 = vld [vmem:[%s3395_s27 + $0x8] sm:$0xff] }
 0x982   : > { %v2849_v55 = vpack.c.bf16 %v2286_v11, %v2285_v54 }
 0x984   : > { %2850 = vmatprep.subr.bf16.mxu0 %v2849_v55 }
 0x9a2   : > { %v1946_v61 = vpop.f32.mrb[12].mxu0 }
 0x9a3   : > { %v2026_v62 = vmul.f32 %v2990_v60, %v1946_v61  ;;  %v2778_v63 = vpop.f32.mrb[13].mxu0  ;;  %v2291_v60 = vld [vmem:[%s3395_s27 + $0x30] sm:$0xff]  ;;  %v2292_v61 = vld [vmem:[%s3395_s27 + $0x38] sm:$0xff] }
 0x9a4   : > { %v2617_v63 = vld [vmem:[%s531_s25] ss:$0 sm:$0xff] }
 0x9a5   : > { %2030 = vrot.lane.b32.xlu0 %v2026_v62, %s3164_s4  ;;  %v2861_v62 = vpack.c.bf16 %v2292_v61, %v2291_v60 }
 0x9a6   : > { %v2022_v1 = vpop.f32.mrb[18].mxu1 }
 0x9a7   : > { %v2027_v4 = vmul.f32 %v2992_v0, %v2022_v1  ;;  %v2783_v5 = vpop.f32.mrb[19].mxu1 }
 0x9a9   : > { %2032 = vrot.lane.b32.xlu1 %v2027_v4, %s3164_s4 }
 0xa17   : > { %v2031_v7 = vpop.permute.xlu0 %2030 }
 0xa18   : > { %2037 = vst.msk [vmem:[#allocation3] sm:$0xff] %vm2036_vm6, %v2031_v7 }
 0xa1b   : > { %v2033_v9 = vpop.permute.xlu1 %2032 }
 0xa1c   : > { %2038 = vst.msk [vmem:[#allocation3 + $0x8] sm:$0xff] %vm2036_vm6, %v2033_v9 }
 0xa1f   : > { %v2039_v10 = vld [vmem:[#allocation3] sm:$0xff] }
 0xa20   : > { %2792 = vmatprep.mubr.msk.f32.mxu0 %vm553_vm1, %v2039_v10 }
 0xa23   : > { %v2040_v12 = vld [vmem:[#allocation3 + $0x8] sm:$0xff] }
 0xa24   : > { %2793 = vmatmul.mubr.msk.f32.vlgmr.msra.gmra.mrb[14].mxu0 %vm553_vm1, %v2040_v12 }
 0xa25   : > { %2852 = vmatpush3.bf16.msra.mxu0 %v2849_v55 }
 0xa26   : > { %2854 = vmatprep.subr.bf16.mxu0 %v2853_v31 }
 0xa29   : > { %2856 = vmatpush3.bf16.msra.mxu0 %v2853_v31 }
 0xa2a   : > { %2858 = vmatprep.subr.bf16.mxu0 %v2857_v59 }
 0xa2d   : > { %2860 = vmatpush3.bf16.msra.mxu0 %v2857_v59 }
 0xa2e   : > { %2862 = vmatprep.subr.bf16.mxu0 %v2861_v62 }
 0xa31   : > { %2864 = vmatpush3.bf16.msra.mxu0 %v2861_v62 }
 0xaf7   : > { %v2794_v43 = vpop.f32.mrb[14].mxu0 }
 0xaf8   : > { %v2127_v15 = vadd.f32 %v2794_v43, %v3404_v3  ;;  %v2117_v16 = vpop.f32.mrb[15].mxu0 }
 0xaf9   : > { %v2126_v17 = vadd.f32 %v2117_v16, %v3402_v2 }
 0xafa   : > { %v3606_v18 = vadd.f32 %v2616_v14, %v2127_v15 }
 0xafb   : > { %v3608_v19 = vadd.f32 %v2616_v14, %v2126_v17 }
 0xafc   : > { %v2140_v46 = vsel %vm553_vm1, %v3606_v18, 0.0 }
 0xafd   : > { %2141 = vadd.xlane.f32.xlu1 %v2140_v46  ;;  %v2137_v20 = vsel %vm553_vm1, %v3608_v19, 0.0 }
 0xafe   : > { %2138 = vadd.xlane.f32.xlu0 %v2137_v20 }
 0xb8a   : > { %v2142_v48 = vpop.xlane.xlu1 %2141 }
 0xb8b   : > { %v2144_v21 = vmul.f32 0.03125, %v2142_v48  ;;  %v2139_v3 = vpop.xlane.xlu0 %2138 }
 0xb8c   : > { %v2143_v2 = vmul.f32 0.03125, %v2139_v3 }
 0xb8d   : > { %v2146_v22 = vsub.f32 %v3606_v18, %v2144_v21 }
 0xb8e   : > { %v2145_v23 = vsub.f32 %v3608_v19, %v2143_v2 }
 0xb8f   : > { %v2148_v26 = vmul.f32 %v2146_v22, %v2146_v22 }
 0xb90   : > { %v2147_v24 = vmul.f32 %v2145_v23, %v2145_v23 }
 0xb91   : > { %v2152_v27 = vsel %vm553_vm1, %v2148_v26, 0.0  ;;  %v2622_v26 = vld [vmem:[%s539_s11] ss:$0 sm:$0xff] }
 0xb92   : > { %v2149_v25 = vsel %vm553_vm1, %v2147_v24, 0.0 }
 0xb93   : > { %2150 = vadd.xlane.f32.xlu0 %v2149_v25 }
 0xb97   : > { %2153 = vadd.xlane.f32.xlu0 %v2152_v27 }
 0xc20   : > { %v2151_v36 = vpop.xlane.xlu0 %2150 }
 0xc21   : > { %v2155_v6 = vmul.f32 0.03125, %v2151_v36 }
 0xc23   : > { %v2157_v38 = vadd.f32 1e-06, %v2155_v6 }
 0xc24   : > { %v2154_v40 = vpop.xlane.xlu0 %2153 }
 0xc25   : > { %2993 = vrsqrt.f32 %v2157_v38  ;;  %v2156_v8 = vmul.f32 0.03125, %v2154_v40 }
 0xc27   : > { %v2158_v41 = vadd.f32 1e-06, %v2156_v8 }
 0xc29   : > { %2995 = vrsqrt.f32 %v2158_v41 }
 0xc2f   : > { %v2994_v37 = vpop.eup %2993 }
 0xc30   : > { %v2161_v47 = vmul.f32 %v2994_v37, %v2145_v23 }
 0xc32   : > { %v2167_v39 = vmul.f32 %v2166_v45, %v2161_v47 }
 0xc33   : > { %v2996_v50 = vpop.eup %2995 }
 0xc34   : > { %v2162_v51 = vmul.f32 %v2996_v50, %v2146_v22  ;;  %v2173_v52 = vadd.f32 %v2172_v49, %v2167_v39 }
 0xc36   : > { %v2168_v53 = vmul.f32 %v2166_v45, %v2162_v51  ;;  %2803 = vmatprep.mubr.msk.f32.mxu1 %vm553_vm1, %v2173_v52 }
 0xc38   : > { %v2174_v28 = vadd.f32 %v2172_v49, %v2168_v53 }
 0xc3a   : > { %2804 = vmatmul.mubr.msk.f32.vlgmr.msra.gmra.mrb[20].mxu1 %vm553_vm1, %v2174_v28 }
 0xd0d   : > { %v2805_v0 = vpop.f32.mrb[20].mxu1 }
 0xd0e   : > { %v2264_v1 = vadd.f32 %v2805_v0, %v2617_v63  ;;  %v2258_v4 = vpop.f32.mrb[21].mxu1 }
 0xd0f   : > { %v2259_v5 = vadd.f32 %v2617_v63, %v2258_v4 }
 0xd10   : > { %v2270_v7 = vmul.f32 0.044715, %v2264_v1  ;;  %v2268_v22 = vmul.f32 0.5, %v2264_v1 }
 0xd11   : > { %v2269_v9 = vmul.f32 0.044715, %v2259_v5  ;;  %v2267_v3 = vmul.f32 0.5, %v2259_v5 }
 0xd12   : > { %v2272_v10 = vmul.f32 %v2270_v7, %v2264_v1 }
 0xd13   : > { %v2271_v12 = vmul.f32 %v2269_v9, %v2259_v5 }
 0xd14   : > { %v2274_v43 = vmul.f32 %v2272_v10, %v2264_v1 }
 0xd15   : > { %v2273_v14 = vmul.f32 %v2271_v12, %v2259_v5 }
 0xd16   : > { %v2276_v15 = vadd.f32 %v2274_v43, %v2264_v1 }
 0xd17   : > { %v2275_v16 = vadd.f32 %v2273_v14, %v2259_v5 }
 0xd18   : > { %v2278_v17 = vmul.f32 0.7978846, %v2276_v15 }
 0xd19   : > { %v2277_v46 = vmul.f32 0.7978846, %v2275_v16 }
 0xd1a   : > { %2997 = vtanh.f32 %v2278_v17 }
 0xd1b   : > { %2999 = vtanh.f32 %v2277_v46 }
 0xd24   : > { %v2998_v20 = vpop.eup %2997 }
 0xd25   : > { %v3000_v48 = vpop.eup %2999  ;;  %v2282_v21 = vadd.f32 1.0, %v2998_v20 }
 0xd26   : > { %v2281_v2 = vadd.f32 1.0, %v3000_v48 }
 0xd27   : > { %v2284_v24 = vmul.f32 %v2282_v21, %v2268_v22 }
 0xd28   : > { %v2283_v23 = vmul.f32 %v2281_v2, %v2267_v3 }
 0xd2a   : > { %2822 = vmatprep.mubr.msk.f32.mxu0 %vm2293_vm7, %v2283_v23 }
 0xd2b   : > { %2823 = vmatmul.mubr.msk.f32.vlgmr.msra.gmra.mrb[16].mxu0 %vm2293_vm7, %v2284_v24 }
 0xdfc   : > { %2389 = sbr.rel (%p2623_p1) target bundleno = 3589 (0xe05), region = 76 }
 0xdfe   : > { %v2824_v25 = vpop.f32.mrb[16].mxu0 }
 0xdff   : > { %v2376_v27 = vadd.f32 %v2824_v25, %v3606_v18  ;;  %v2366_v29 = vpop.f32.mrb[17].mxu0 }
 0xe00   : > { %v2375_v30 = vadd.f32 %v2366_v29, %v3608_v19 }
 0xe01   : > { %v2385_v32 = vadd.f32 %v2622_v26, %v2376_v27 }
 0xe02   : > { %v2384_v33 = vadd.f32 %v2622_v26, %v2375_v30 }
 0xe03   : > { %2391 = vst.msk [vmem:[#allocation2 + $0x8] sm:$0xff] %vm553_vm1, %v2385_v32 }
 0xe04   : > { %2390 = vst.msk [vmem:[#allocation2] sm:$0xff] %vm553_vm1, %v2384_v33 }
 0xe05 PF: > { %p2624_p5 = scmp.ne.s32.totalorder %s3135_s16, 1 }
 0xe06   : > { %2396 = vst.msk [vmem:[#allocation9] sm:$0xff] (!%p2624_p5), %vm553_vm1, %v2384_v33  ;;  %2397 = vst.msk [vmem:[#allocation9 + $0x8] sm:$0xff] (!%p2624_p5), %vm553_vm1, %v2385_v32 }
 0xe07   : > { %2395 = sbr.rel (%p2624_p5) target bundleno = 3598 (0xe0e), region = 80 }
 0xe0e PF: > { %s3744_s22 = sadd.s32 4294967295, %s3143_s18   ;;  %s3165_s20 = smov [#allocation9]  }
 0xe0f   : > { %p3656_p8 = scmp.eq.s32.totalorder %s3744_s22, 1  ;;  %s2407_s30 = sshll.u32 %s3165_s20, 4  ;;  %s2408_s30 = int_to_ptr.vmem [resolvable:$true] %s2407_s30 }
 0xe10   : > { %s3059_s21 = scalar_lea.vmem %s2408_s30, 256  ;;  %p3066_p13 = scmp.lt.s32.totalorder %s2408_s30, %s2408_s30 }
 0xe11   : > { %p3060_p9 = scmp.ne.s32.totalorder %s2408_s30, %s3059_s21  ;;  %p3067_p2 = scmp.lt.s32.totalorder %s3059_s21, %s3059_s21 }
 0xe13   : > { %p3061_p10 = pnand %p3060_p9, %p3656_p8  ;;  %p3068_p3 = por %p3067_p2, %p3066_p13 }
 0xe15   : > { %p3062_p11 = pneg %p3061_p10 }
 0xe17   : > { %p3069_p0 = pnand %p3068_p3, %p3062_p11 }
 0xe19   : > { %3072 = shalt.err (!%p3069_p0)
}
 0xe1a   : > { %s3746_s24 = sld [smem:[#allocation20_spill]] }
 0xe20   : > { %s3073_s28 = scalar_lea.hbm %s3746_s24, 256 }
 0xe21   : > { %p3074_p12 = scmp.ne.s32.totalorder %s3746_s24, %s3073_s28  ;;  %p3079_p4 = scmp.lt.u32.totalorder %s3073_s28, %s3746_s24 }
 0xe23   : > { %p3075_p6 = pnand %p3074_p12, %p3656_p8 }
 0xe25   : > { %p3076_p7 = pneg %p3075_p6 }
 0xe27   : > { %p3081_p1 = pnand %p3079_p4, %p3076_p7 }
 0xe29   : > { %3084 = shalt.err (!%p3081_p1)
}
 0xe2a   : > { %s3166_s4 = smov 128  }
 0xe2b   : > { %2872 = dma.vmem_to_hbm [thread:$0]  (%p3656_p8), %s2408_s30, 256, %s3746_s24, [#allocation6], %s3166_s4, %s3166_s4, %s3162_s1  }
 0xe2c   : > { %3118 = dma.done.wait (%p3656_p8), [#allocation6], 256  }
 0xe2d   : > { %3120 = vsyncadd (%p3656_p8), [#allocation6], 4294967040 }
 0xe2e PF: > { %s25_s18 = sadd.s32 1, %s3143_s18   ;;  %s3747_s16 = sld [smem:[#allocation13_spill]] }
 0xe2f   : > { %p22_p5 = scmp.ge.s32.totalorder %s25_s18, 4   ;;  %s3748_s17 = sld [smem:[#allocation14_spill]] }
 0xe30   : > { %s3749_s13 = smov %s3127_s14  ;;  %s3750_s14 = smov %s3131_s15 }
 0xe31   : > { %s3751_s15 = smov %s3307_s10  ;;  %24 = sbr.rel (!%p22_p5) target bundleno = 13 (0xd), region = 140 }
 0xe38   :  { %2423 = vsyncpa [#allocation5], 1 }
 0xe39   :  { %2425 = vsyncpa [#allocation5 + $0x1], 1 }
 0xe3a   :  { %2426 = vsyncpa [#allocation8], 1 }
 0xe3b   :  { %2428 = vsyncpa [#allocation8 + $0x1], 1 }
 0xe3c   :  { %2429 = vsyncpa [#allocation6], 1 }
 0xe3d   :  { %2431 = vsyncpa [#allocation6 + $0x1], 1 }

</bundles_post_ra>
